<compile_context>
chip_gen: v6e
topology: v6e:2x2x1
jax: 0.10.0
libtpu: 0.0.40
codegen_flags: <defaults>
</compile_context>

<pallas_src>
import functools
import math

import jax
import jax.numpy as jnp
from jax import lax
from jax.experimental import pallas as pl
from jax.experimental.pallas import tpu as pltpu


def _fusion_kernel(x_ref, z_ref, wq_ref, bq_ref, wkv_ref, bkv_ref,
                   wo_ref, bo_ref, o_ref, attn_ref, *,
                   bb, nq, nkv, num_heads, d_head, c_out, kv_tile):
    """One grid step = BB batch elements.

    x_ref   : (BB*Nq,  C_in)   bf16
    z_ref   : (BB*Nkv, C_in)   bf16
    wq_ref  : (C_in, C_out)    bf16   (softmax scale pre-folded)
    bq_ref  : (1, C_out)       f32    (scale pre-folded)
    wkv_ref : (C_in, 2*C_out)  bf16   (K and V projections fused)
    bkv_ref : (1, 2*C_out)     f32
    wo_ref  : (C_out, C_out)   bf16
    bo_ref  : (1, C_out)       f32
    o_ref   : (BB*Nq, C_out)   output dtype
    attn_ref: (BB*Nq, C_out)   f32 VMEM scratch (pre-projection attention)
    """
    # Fused projections over all BB batch rows at once: bf16 MXU operands,
    # f32 accumulation.
    q = jnp.dot(x_ref[...], wq_ref[...],
                preferred_element_type=jnp.float32) + bq_ref[...]
    kv = jnp.dot(z_ref[...], wkv_ref[...],
                 preferred_element_type=jnp.float32) + bkv_ref[...]

    # bf16 copies feed the MXU; softmax math below stays f32.
    q16 = q.astype(jnp.bfloat16)
    k16 = kv[:, :c_out].astype(jnp.bfloat16)
    v16 = kv[:, c_out:].astype(jnp.bfloat16)

    n_chunks = (nkv + kv_tile - 1) // kv_tile

    for b in range(bb):
        qb = q16[b * nq:(b + 1) * nq, :]
        kb = k16[b * nkv:(b + 1) * nkv, :]
        vb = v16[b * nkv:(b + 1) * nkv, :]
        for h in range(num_heads):
            lo = h * d_head
            hi = lo + d_head
            qh = qb[:, lo:hi]                                    # (Nq, D)

            # Online softmax over KV tiles: only an (Nq, kv_tile) score tile is
            # ever live, keeping VMEM bounded for large Nkv.
            m = jnp.full((nq, 1), -jnp.inf, dtype=jnp.float32)
            l = jnp.zeros((nq, 1), dtype=jnp.float32)
            acc = jnp.zeros((nq, d_head), dtype=jnp.float32)
            for c in range(n_chunks):
                c0 = c * kv_tile
                c1 = min(c0 + kv_tile, nkv)
                kh = kb[c0:c1, lo:hi]                            # (tkv, D)
                vh = vb[c0:c1, lo:hi]                            # (tkv, D)
                # Q @ K^T via transposed contraction (no XLU transpose of K).
                s = lax.dot_general(qh, kh, (((1,), (1,)), ((), ())),
                                    preferred_element_type=jnp.float32)
                m_new = jnp.maximum(m, jnp.max(s, axis=-1, keepdims=True))
                alpha = jnp.exp(m - m_new)
                p = jnp.exp(s - m_new)
                l = alpha * l + jnp.sum(p, axis=-1, keepdims=True)
                acc = alpha * acc + jnp.dot(p.astype(jnp.bfloat16), vh,
                                            preferred_element_type=jnp.float32)
                m = m_new

            # Exact normalization (cheap VPU divide), written straight into the
            # shared scratch -> no jnp.concatenate of narrow per-head slabs.
            attn_ref[b * nq:(b + 1) * nq, lo:hi] = acc / l

    # Single full-width output projection (C_out contraction, bf16 MXU).
    attn = attn_ref[...].astype(jnp.bfloat16)
    out = jnp.dot(attn, wo_ref[...],
                  preferred_element_type=jnp.float32) + bo_ref[...]
    o_ref[...] = out.astype(o_ref.dtype)


def _pick_batch_block(b, nq, nkv):
    """Largest divisor of `b` that keeps row blocks sublane-aligned while
    leaving a grid of >= 2 steps (so both v7x TensorCores get work)."""
    cap = max(1, min(8, b // 2))
    best = 1
    for d in range(1, b + 1):
        if b % d != 0 or d > cap:
            continue
        if (d * nq) % 8 == 0 and (d * nkv) % 8 == 0:
            best = d
    return best


def fusion_block_forward(x, z, wq, bq, wk, bk, wv, bv, wo, bo, num_heads,
                         *, batch_block=None, kv_tile=512):
    """Fused cross-attention forward: (B,Nq,C_in),(B,Nkv,C_in) -> (B,Nq,C_out)."""
    B, Nq, C_in = x.shape
    Nkv = z.shape[1]
    C_out = wq.shape[1]
    assert C_out % num_heads == 0
    D = C_out // num_heads
    scale = 1.0 / math.sqrt(D)

    BB = batch_block if batch_block is not None else _pick_batch_block(B, Nq, Nkv)
    assert B % BB == 0
    kv_tile = max(1, min(kv_tile, Nkv))

    # Fold the softmax scale into the query projection (free at runtime), fuse
    # the K/V projections into one matmul, and cast all MXU operands to bf16
    # (halves HBM->VMEM DMA bytes; f32 accumulation preserves precision).
    wq_s = (wq * scale).astype(jnp.bfloat16)
    bq_s = (bq * scale).reshape(1, C_out).astype(jnp.float32)
    wkv = jnp.concatenate([wk, wv], axis=1).astype(jnp.bfloat16)   # (C_in, 2*C_out)
    bkv = jnp.concatenate([bk, bv]).reshape(1, 2 * C_out).astype(jnp.float32)
    wo16 = wo.astype(jnp.bfloat16)
    bo2 = bo.reshape(1, C_out).astype(jnp.float32)

    # Flatten activations to 2-D (rows, channels) slabs (free, contiguous
    # reshape) so the kernel runs pure 2-D matmuls with no in-kernel reshapes.
    x2 = x.reshape(B * Nq, C_in).astype(jnp.bfloat16)
    z2 = z.reshape(B * Nkv, C_in).astype(jnp.bfloat16)

    kernel = functools.partial(
        _fusion_kernel, bb=BB, nq=Nq, nkv=Nkv, num_heads=num_heads,
        d_head=D, c_out=C_out, kv_tile=kv_tile)
    grid = (B // BB,)

    # Explicit VMEM budget: double-buffered activation blocks, weights (worst
    # case double-buffered), q/kv intermediates + bf16 copies, scratch, and a
    # few live score tiles.
    est = ((BB * Nq * C_in + BB * Nkv * C_in) * 2 * 2
           + BB * Nq * C_out * 4 * 2
           + ((C_in * C_out + C_in * 2 * C_out + C_out * C_out) * 2
              + 4 * C_out * 4) * 2
           + (BB * Nq * C_out + BB * Nkv * 2 * C_out) * (4 + 2)
           + BB * Nq * C_out * 4
           + 4 * Nq * kv_tile * 4)
    vmem_limit = int(min(max(2 * est, 16 * 2 ** 20), 64 * 2 ** 20))

    def _build(single_buffered_weights):
        def _w_spec(shape):
            idx = lambda i, _nd=len(shape): (0,) * _nd
            if single_buffered_weights:
                # Constant index_map across the grid -> one VMEM copy suffices.
                return pl.BlockSpec(shape, idx, pipeline_mode=pl.Buffered(1))
            return pl.BlockSpec(shape, idx)

        return pl.pallas_call(
            kernel,
            out_shape=jax.ShapeDtypeStruct((B * Nq, C_out), x.dtype),
            grid_spec=pltpu.PrefetchScalarGridSpec(
                num_scalar_prefetch=0,
                grid=grid,
                in_specs=[
                    pl.BlockSpec((BB * Nq, C_in), lambda i: (i, 0)),    # x rows
                    pl.BlockSpec((BB * Nkv, C_in), lambda i: (i, 0)),   # z rows
                    _w_spec((C_in, C_out)),                             # Wq (scaled)
                    _w_spec((1, C_out)),                                # bq (scaled)
                    _w_spec((C_in, 2 * C_out)),                         # Wkv
                    _w_spec((1, 2 * C_out)),                            # bkv
                    _w_spec((C_out, C_out)),                            # Wo
                    _w_spec((1, C_out)),                                # bo
                ],
                out_specs=pl.BlockSpec((BB * Nq, C_out), lambda i: (i, 0)),
                scratch_shapes=[pltpu.VMEM((BB * Nq, C_out), jnp.float32)],
            ),
            compiler_params=pltpu.CompilerParams(
                dimension_semantics=("parallel",),
                vmem_limit_bytes=vmem_limit),
        )

    try:
        out2 = _build(True)(x2, z2, wq_s, bq_s, wkv, bkv, wo16, bo2)
        out2 = jax.block_until_ready(out2)
    except Exception:
        # pipeline_mode=pl.Buffered(1) not supported by this jax build: fall
        # back to default (double-buffered) weight specs.
        out2 = _build(False)(x2, z2, wq_s, bq_s, wkv, bkv, wo16, bo2)

    # TODO(synk): for Nkv too large for one VMEM-resident z block, add a grid
    # axis over KV tiles (flash-style) instead of only in-kernel chunking; also
    # consider packing heads into one batched dot (D=8 slivers use ~3-6% of the
    # MXU) and lane-folding the output when C_out < 128.
    return out2.reshape(B, Nq, C_out)


class FusionBlockPallas:
    """JAX/Pallas port of Fusion_block: forward(x, y, z) = MHA(x, z, z)."""

    def __init__(self, in_channels, out_channels, num_heads=4, key=None):
        if key is None:
            key = jax.random.PRNGKey(0)
        ks = jax.random.split(key, 8)
        s_in = 1.0 / math.sqrt(in_channels)
        s_out = 1.0 / math.sqrt(out_channels)
        self.num_heads = num_heads
        self.Wq = jax.random.uniform(ks[0], (in_channels, out_channels),
                                     jnp.float32, -s_in, s_in)
        self.bq = jax.random.uniform(ks[1], (out_channels,), jnp.float32, -s_in, s_in)
        self.Wk = jax.random.uniform(ks[2], (in_channels, out_channels),
                                     jnp.float32, -s_in, s_in)
        self.bk = jax.random.uniform(ks[3], (out_channels,), jnp.float32, -s_in, s_in)
        self.Wv = jax.random.uniform(ks[4], (in_channels, out_channels),
                                     jnp.float32, -s_in, s_in)
        self.bv = jax.random.uniform(ks[5], (out_channels,), jnp.float32, -s_in, s_in)
        self.Wo = jax.random.uniform(ks[6], (out_channels, out_channels),
                                     jnp.float32, -s_out, s_out)
        self.bo = jax.random.uniform(ks[7], (out_channels,), jnp.float32, -s_out, s_out)

    def __call__(self, x, y, z):
        # y is unused, matching the PyTorch forward: return self.ca(x, z, z)
        del y
        return fusion_block_forward(x, z,
                                    self.Wq, self.bq,
                                    self.Wk, self.bk,
                                    self.Wv, self.bv,
                                    self.Wo, self.bo,
                                    self.num_heads)


def _reference_forward(x, z, block):
    """Pure-JAX (f32) reference of the whole block for correctness checking."""
    H = block.num_heads
    q = jnp.einsum("bnc,cd->bnd", x, block.Wq) + block.bq
    k = jnp.einsum("bnc,cd->bnd", z, block.Wk) + block.bk
    v = jnp.einsum("bnc,cd->bnd", z, block.Wv) + block.bv
    B, Nq, C = q.shape
    Nkv = k.shape[1]
    D = C // H
    qh = q.reshape(B, Nq, H, D).transpose(0, 2, 1, 3)
    kh = k.reshape(B, Nkv, H, D).transpose(0, 2, 1, 3)
    vh = v.reshape(B, Nkv, H, D).transpose(0, 2, 1, 3)
    s = jnp.einsum("bhqd,bhkd->bhqk", qh, kh) / math.sqrt(D)
    p = jax.nn.softmax(s, axis=-1)
    o = jnp.einsum("bhqk,bhkd->bhqd", p, vh)
    o = o.transpose(0, 2, 1, 3).reshape(B, Nq, C)
    return jnp.einsum("bnd,de->bne", o, block.Wo) + block.bo


if __name__ == "__main__":
    key = jax.random.PRNGKey(0)
    kx, ky, kz, kp = jax.random.split(key, 4)

    B, Nq, Nkv = 2, 8, 8
    C_in, C_out = 32, 32

    x = jax.random.normal(kx, (B, Nq, C_in), jnp.float32)
    y = jax.random.normal(ky, (B, Nq, C_in), jnp.float32)   # unused by forward
    z = jax.random.normal(kz, (B, Nkv, C_in), jnp.float32)

    block = FusionBlockPallas(C_in, C_out, num_heads=4, key=kp)
    out = jax.block_until_ready(block(x, y, z))
    assert out.shape == (B, Nq, C_out)

    # Correctness check against a pure-f32 reference. Tolerance covers the
    # bf16 MXU-operand rounding; softmax normalization itself is exact.
    ref = _reference_forward(x, z, block)
    max_err = float(jnp.max(jnp.abs(out - ref)))
    assert jnp.allclose(out, ref, atol=5e-2, rtol=5e-2), max_err

    print("KERNEL_OK")
</pallas_src>

<mosaic_0001>
module attributes {stable_mosaic.version = 11 : i64} {
  func.func @_fusion_kernel(%arg0: i32, %arg1: memref<8x32xbf16, #tpu.memory_space<vmem>>, %arg2: memref<8x32xbf16, #tpu.memory_space<vmem>>, %arg3: memref<32x32xbf16, #tpu.memory_space<vmem>>, %arg4: memref<1x32xf32, #tpu.memory_space<vmem>>, %arg5: memref<32x64xbf16, #tpu.memory_space<vmem>>, %arg6: memref<1x64xf32, #tpu.memory_space<vmem>>, %arg7: memref<32x32xbf16, #tpu.memory_space<vmem>>, %arg8: memref<1x32xf32, #tpu.memory_space<vmem>>, %arg9: memref<8x32xf32, #tpu.memory_space<vmem>>, %arg10: memref<8x32xf32, #tpu.memory_space<vmem>>) attributes {dimension_semantics = [#tpu.dimension_semantics<parallel>], iteration_bounds = array<i64: 2>, scalar_prefetch = 0 : i64, scratch_operands = 1 : i64, tpu.core_type = #tpu.core_type<tc>, window_params = [{transform_indices = @transform_0, window_bounds = array<i64: 8, 32>}, {transform_indices = @transform_1, window_bounds = array<i64: 8, 32>}, {pipeline_mode = #tpu.pipeline_mode<synchronous>, transform_indices = @transform_2, window_bounds = array<i64: 32, 32>}, {pipeline_mode = #tpu.pipeline_mode<synchronous>, transform_indices = @transform_3, window_bounds = array<i64: 1, 32>}, {pipeline_mode = #tpu.pipeline_mode<synchronous>, transform_indices = @transform_4, window_bounds = array<i64: 32, 64>}, {pipeline_mode = #tpu.pipeline_mode<synchronous>, transform_indices = @transform_5, window_bounds = array<i64: 1, 64>}, {pipeline_mode = #tpu.pipeline_mode<synchronous>, transform_indices = @transform_6, window_bounds = array<i64: 32, 32>}, {pipeline_mode = #tpu.pipeline_mode<synchronous>, transform_indices = @transform_7, window_bounds = array<i64: 1, 32>}, {transform_indices = @transform_8, window_bounds = array<i64: 8, 32>}]} {
    %c0 = arith.constant 0 : index
    %c0_0 = arith.constant 0 : index
    %0 = vector.load %arg1[%c0, %c0_0] : memref<8x32xbf16, #tpu.memory_space<vmem>>, vector<8x32xbf16>
    %c0_1 = arith.constant 0 : index
    %c0_2 = arith.constant 0 : index
    %1 = vector.load %arg3[%c0_1, %c0_2] : memref<32x32xbf16, #tpu.memory_space<vmem>>, vector<32x32xbf16>
    %cst = arith.constant dense<0.000000e+00> : vector<8x32xf32>
    %2 = tpu.matmul %0, %1, %cst {dimension_numbers = #tpu.dot_dimension_numbers<[1], [0], [0], [1], [0, 0, 1, 1], [], []>} : vector<8x32xbf16>, vector<32x32xbf16>, vector<8x32xf32> -> vector<8x32xf32>
    %c0_3 = arith.constant 0 : index
    %c0_4 = arith.constant 0 : index
    %3 = vector.load %arg4[%c0_3, %c0_4] : memref<1x32xf32, #tpu.memory_space<vmem>>, vector<1x32xf32>
    %4 = vector.broadcast %3 : vector<1x32xf32> to vector<8x32xf32>
    %5 = arith.addf %2, %4 : vector<8x32xf32>
    %c0_5 = arith.constant 0 : index
    %c0_6 = arith.constant 0 : index
    %6 = vector.load %arg2[%c0_5, %c0_6] : memref<8x32xbf16, #tpu.memory_space<vmem>>, vector<8x32xbf16>
    %c0_7 = arith.constant 0 : index
    %c0_8 = arith.constant 0 : index
    %7 = vector.load %arg5[%c0_7, %c0_8] : memref<32x64xbf16, #tpu.memory_space<vmem>>, vector<32x64xbf16>
    %cst_9 = arith.constant dense<0.000000e+00> : vector<8x64xf32>
    %8 = tpu.matmul %6, %7, %cst_9 {dimension_numbers = #tpu.dot_dimension_numbers<[1], [0], [0], [1], [0, 0, 1, 1], [], []>} : vector<8x32xbf16>, vector<32x64xbf16>, vector<8x64xf32> -> vector<8x64xf32>
    %c0_10 = arith.constant 0 : index
    %c0_11 = arith.constant 0 : index
    %9 = vector.load %arg6[%c0_10, %c0_11] : memref<1x64xf32, #tpu.memory_space<vmem>>, vector<1x64xf32>
    %10 = vector.broadcast %9 : vector<1x64xf32> to vector<8x64xf32>
    %11 = arith.addf %8, %10 : vector<8x64xf32>
    %12 = arith.truncf %5 : vector<8x32xf32> to vector<8x32xbf16>
    %13 = vector.extract_strided_slice %11 {offsets = [0, 0], sizes = [8, 32], strides = [1, 1]} : vector<8x64xf32> to vector<8x32xf32>
    %14 = arith.truncf %13 : vector<8x32xf32> to vector<8x32xbf16>
    %15 = vector.extract_strided_slice %11 {offsets = [0, 32], sizes = [8, 32], strides = [1, 1]} : vector<8x64xf32> to vector<8x32xf32>
    %16 = arith.truncf %15 : vector<8x32xf32> to vector<8x32xbf16>
    %17 = vector.extract_strided_slice %12 {offsets = [0, 0], sizes = [8, 8], strides = [1, 1]} : vector<8x32xbf16> to vector<8x8xbf16>
    %cst_12 = arith.constant 0xFF800000 : f32
    %18 = vector.broadcast %cst_12 : f32 to vector<8x1xf32>
    %cst_13 = arith.constant 0.000000e+00 : f32
    %19 = vector.broadcast %cst_13 : f32 to vector<8x1xf32>
    %cst_14 = arith.constant 0.000000e+00 : f32
    %20 = vector.broadcast %cst_14 : f32 to vector<8x8xf32>
    %21 = vector.extract_strided_slice %14 {offsets = [0, 0], sizes = [8, 8], strides = [1, 1]} : vector<8x32xbf16> to vector<8x8xbf16>
    %22 = vector.extract_strided_slice %16 {offsets = [0, 0], sizes = [8, 8], strides = [1, 1]} : vector<8x32xbf16> to vector<8x8xbf16>
    %cst_15 = arith.constant dense<0.000000e+00> : vector<8x8xf32>
    %23 = tpu.matmul %17, %21, %cst_15 {dimension_numbers = #tpu.dot_dimension_numbers<[1], [1], [0], [0], [0, 0, 1, 0], [], []>} : vector<8x8xbf16>, vector<8x8xbf16>, vector<8x8xf32> -> vector<8x8xf32>
    %cst_16 = arith.constant dense<0xFF800000> : vector<8xf32>
    %24 = vector.multi_reduction <maximumf>, %23, %cst_16 [1] : vector<8x8xf32> to vector<8xf32>
    %25 = vector.shape_cast %24 : vector<8xf32> to vector<8x1xf32>
    %26 = arith.maximumf %18, %25 : vector<8x1xf32>
    %27 = arith.subf %18, %26 : vector<8x1xf32>
    %28 = math.exp %27 : vector<8x1xf32>
    %29 = vector.broadcast %26 : vector<8x1xf32> to vector<8x8xf32>
    %30 = arith.subf %23, %29 : vector<8x8xf32>
    %31 = math.exp %30 : vector<8x8xf32>
    %32 = arith.mulf %28, %19 : vector<8x1xf32>
    %cst_17 = arith.constant dense<0.000000e+00> : vector<8xf32>
    %33 = vector.multi_reduction <add>, %31, %cst_17 [1] : vector<8x8xf32> to vector<8xf32>
    %34 = vector.shape_cast %33 : vector<8xf32> to vector<8x1xf32>
    %35 = arith.addf %32, %34 : vector<8x1xf32>
    %36 = vector.broadcast %28 : vector<8x1xf32> to vector<8x8xf32>
    %37 = arith.mulf %36, %20 : vector<8x8xf32>
    %38 = arith.truncf %31 : vector<8x8xf32> to vector<8x8xbf16>
    %cst_18 = arith.constant dense<0.000000e+00> : vector<8x8xf32>
    %39 = tpu.matmul %38, %22, %cst_18 {dimension_numbers = #tpu.dot_dimension_numbers<[1], [0], [0], [1], [0, 0, 1, 1], [], []>} : vector<8x8xbf16>, vector<8x8xbf16>, vector<8x8xf32> -> vector<8x8xf32>
    %40 = arith.addf %37, %39 : vector<8x8xf32>
    %41 = vector.broadcast %35 : vector<8x1xf32> to vector<8x8xf32>
    %42 = arith.divf %40, %41 : vector<8x8xf32>
    %c0_19 = arith.constant 0 : index
    %c0_20 = arith.constant 0 : index
    %43 = vector.load %arg10[%c0_19, %c0_20] : memref<8x32xf32, #tpu.memory_space<vmem>>, vector<8x8xf32>
    tpu.vector_store %arg10[%c0_19, %c0_20], %42 {strides = array<i32>} : memref<8x32xf32, #tpu.memory_space<vmem>>, vector<8x8xf32>,
    %44 = vector.extract_strided_slice %12 {offsets = [0, 8], sizes = [8, 8], strides = [1, 1]} : vector<8x32xbf16> to vector<8x8xbf16>
    %cst_21 = arith.constant 0xFF800000 : f32
    %45 = vector.broadcast %cst_21 : f32 to vector<8x1xf32>
    %cst_22 = arith.constant 0.000000e+00 : f32
    %46 = vector.broadcast %cst_22 : f32 to vector<8x1xf32>
    %cst_23 = arith.constant 0.000000e+00 : f32
    %47 = vector.broadcast %cst_23 : f32 to vector<8x8xf32>
    %48 = vector.extract_strided_slice %14 {offsets = [0, 8], sizes = [8, 8], strides = [1, 1]} : vector<8x32xbf16> to vector<8x8xbf16>
    %49 = vector.extract_strided_slice %16 {offsets = [0, 8], sizes = [8, 8], strides = [1, 1]} : vector<8x32xbf16> to vector<8x8xbf16>
    %cst_24 = arith.constant dense<0.000000e+00> : vector<8x8xf32>
    %50 = tpu.matmul %44, %48, %cst_24 {dimension_numbers = #tpu.dot_dimension_numbers<[1], [1], [0], [0], [0, 0, 1, 0], [], []>} : vector<8x8xbf16>, vector<8x8xbf16>, vector<8x8xf32> -> vector<8x8xf32>
    %cst_25 = arith.constant dense<0xFF800000> : vector<8xf32>
    %51 = vector.multi_reduction <maximumf>, %50, %cst_25 [1] : vector<8x8xf32> to vector<8xf32>
    %52 = vector.shape_cast %51 : vector<8xf32> to vector<8x1xf32>
    %53 = arith.maximumf %45, %52 : vector<8x1xf32>
    %54 = arith.subf %45, %53 : vector<8x1xf32>
    %55 = math.exp %54 : vector<8x1xf32>
    %56 = vector.broadcast %53 : vector<8x1xf32> to vector<8x8xf32>
    %57 = arith.subf %50, %56 : vector<8x8xf32>
    %58 = math.exp %57 : vector<8x8xf32>
    %59 = arith.mulf %55, %46 : vector<8x1xf32>
    %cst_26 = arith.constant dense<0.000000e+00> : vector<8xf32>
    %60 = vector.multi_reduction <add>, %58, %cst_26 [1] : vector<8x8xf32> to vector<8xf32>
    %61 = vector.shape_cast %60 : vector<8xf32> to vector<8x1xf32>
    %62 = arith.addf %59, %61 : vector<8x1xf32>
    %63 = vector.broadcast %55 : vector<8x1xf32> to vector<8x8xf32>
    %64 = arith.mulf %63, %47 : vector<8x8xf32>
    %65 = arith.truncf %58 : vector<8x8xf32> to vector<8x8xbf16>
    %cst_27 = arith.constant dense<0.000000e+00> : vector<8x8xf32>
    %66 = tpu.matmul %65, %49, %cst_27 {dimension_numbers = #tpu.dot_dimension_numbers<[1], [0], [0], [1], [0, 0, 1, 1], [], []>} : vector<8x8xbf16>, vector<8x8xbf16>, vector<8x8xf32> -> vector<8x8xf32>
    %67 = arith.addf %64, %66 : vector<8x8xf32>
    %68 = vector.broadcast %62 : vector<8x1xf32> to vector<8x8xf32>
    %69 = arith.divf %67, %68 : vector<8x8xf32>
    %c0_28 = arith.constant 0 : index
    %c8 = arith.constant 8 : index
    %70 = vector.load %arg10[%c0_28, %c8] : memref<8x32xf32, #tpu.memory_space<vmem>>, vector<8x8xf32>
    tpu.vector_store %arg10[%c0_28, %c8], %69 {strides = array<i32>} : memref<8x32xf32, #tpu.memory_space<vmem>>, vector<8x8xf32>,
    %71 = vector.extract_strided_slice %12 {offsets = [0, 16], sizes = [8, 8], strides = [1, 1]} : vector<8x32xbf16> to vector<8x8xbf16>
    %cst_29 = arith.constant 0xFF800000 : f32
    %72 = vector.broadcast %cst_29 : f32 to vector<8x1xf32>
    %cst_30 = arith.constant 0.000000e+00 : f32
    %73 = vector.broadcast %cst_30 : f32 to vector<8x1xf32>
    %cst_31 = arith.constant 0.000000e+00 : f32
    %74 = vector.broadcast %cst_31 : f32 to vector<8x8xf32>
    %75 = vector.extract_strided_slice %14 {offsets = [0, 16], sizes = [8, 8], strides = [1, 1]} : vector<8x32xbf16> to vector<8x8xbf16>
    %76 = vector.extract_strided_slice %16 {offsets = [0, 16], sizes = [8, 8], strides = [1, 1]} : vector<8x32xbf16> to vector<8x8xbf16>
    %cst_32 = arith.constant dense<0.000000e+00> : vector<8x8xf32>
    %77 = tpu.matmul %71, %75, %cst_32 {dimension_numbers = #tpu.dot_dimension_numbers<[1], [1], [0], [0], [0, 0, 1, 0], [], []>} : vector<8x8xbf16>, vector<8x8xbf16>, vector<8x8xf32> -> vector<8x8xf32>
    %cst_33 = arith.constant dense<0xFF800000> : vector<8xf32>
    %78 = vector.multi_reduction <maximumf>, %77, %cst_33 [1] : vector<8x8xf32> to vector<8xf32>
    %79 = vector.shape_cast %78 : vector<8xf32> to vector<8x1xf32>
    %80 = arith.maximumf %72, %79 : vector<8x1xf32>
    %81 = arith.subf %72, %80 : vector<8x1xf32>
    %82 = math.exp %81 : vector<8x1xf32>
    %83 = vector.broadcast %80 : vector<8x1xf32> to vector<8x8xf32>
    %84 = arith.subf %77, %83 : vector<8x8xf32>
    %85 = math.exp %84 : vector<8x8xf32>
    %86 = arith.mulf %82, %73 : vector<8x1xf32>
    %cst_34 = arith.constant dense<0.000000e+00> : vector<8xf32>
    %87 = vector.multi_reduction <add>, %85, %cst_34 [1] : vector<8x8xf32> to vector<8xf32>
    %88 = vector.shape_cast %87 : vector<8xf32> to vector<8x1xf32>
    %89 = arith.addf %86, %88 : vector<8x1xf32>
    %90 = vector.broadcast %82 : vector<8x1xf32> to vector<8x8xf32>
    %91 = arith.mulf %90, %74 : vector<8x8xf32>
    %92 = arith.truncf %85 : vector<8x8xf32> to vector<8x8xbf16>
    %cst_35 = arith.constant dense<0.000000e+00> : vector<8x8xf32>
    %93 = tpu.matmul %92, %76, %cst_35 {dimension_numbers = #tpu.dot_dimension_numbers<[1], [0], [0], [1], [0, 0, 1, 1], [], []>} : vector<8x8xbf16>, vector<8x8xbf16>, vector<8x8xf32> -> vector<8x8xf32>
    %94 = arith.addf %91, %93 : vector<8x8xf32>
    %95 = vector.broadcast %89 : vector<8x1xf32> to vector<8x8xf32>
    %96 = arith.divf %94, %95 : vector<8x8xf32>
    %c0_36 = arith.constant 0 : index
    %c16 = arith.constant 16 : index
    %97 = vector.load %arg10[%c0_36, %c16] : memref<8x32xf32, #tpu.memory_space<vmem>>, vector<8x8xf32>
    tpu.vector_store %arg10[%c0_36, %c16], %96 {strides = array<i32>} : memref<8x32xf32, #tpu.memory_space<vmem>>, vector<8x8xf32>,
    %98 = vector.extract_strided_slice %12 {offsets = [0, 24], sizes = [8, 8], strides = [1, 1]} : vector<8x32xbf16> to vector<8x8xbf16>
    %cst_37 = arith.constant 0xFF800000 : f32
    %99 = vector.broadcast %cst_37 : f32 to vector<8x1xf32>
    %cst_38 = arith.constant 0.000000e+00 : f32
    %100 = vector.broadcast %cst_38 : f32 to vector<8x1xf32>
    %cst_39 = arith.constant 0.000000e+00 : f32
    %101 = vector.broadcast %cst_39 : f32 to vector<8x8xf32>
    %102 = vector.extract_strided_slice %14 {offsets = [0, 24], sizes = [8, 8], strides = [1, 1]} : vector<8x32xbf16> to vector<8x8xbf16>
    %103 = vector.extract_strided_slice %16 {offsets = [0, 24], sizes = [8, 8], strides = [1, 1]} : vector<8x32xbf16> to vector<8x8xbf16>
    %cst_40 = arith.constant dense<0.000000e+00> : vector<8x8xf32>
    %104 = tpu.matmul %98, %102, %cst_40 {dimension_numbers = #tpu.dot_dimension_numbers<[1], [1], [0], [0], [0, 0, 1, 0], [], []>} : vector<8x8xbf16>, vector<8x8xbf16>, vector<8x8xf32> -> vector<8x8xf32>
    %cst_41 = arith.constant dense<0xFF800000> : vector<8xf32>
    %105 = vector.multi_reduction <maximumf>, %104, %cst_41 [1] : vector<8x8xf32> to vector<8xf32>
    %106 = vector.shape_cast %105 : vector<8xf32> to vector<8x1xf32>
    %107 = arith.maximumf %99, %106 : vector<8x1xf32>
    %108 = arith.subf %99, %107 : vector<8x1xf32>
    %109 = math.exp %108 : vector<8x1xf32>
    %110 = vector.broadcast %107 : vector<8x1xf32> to vector<8x8xf32>
    %111 = arith.subf %104, %110 : vector<8x8xf32>
    %112 = math.exp %111 : vector<8x8xf32>
    %113 = arith.mulf %109, %100 : vector<8x1xf32>
    %cst_42 = arith.constant dense<0.000000e+00> : vector<8xf32>
    %114 = vector.multi_reduction <add>, %112, %cst_42 [1] : vector<8x8xf32> to vector<8xf32>
    %115 = vector.shape_cast %114 : vector<8xf32> to vector<8x1xf32>
    %116 = arith.addf %113, %115 : vector<8x1xf32>
    %117 = vector.broadcast %109 : vector<8x1xf32> to vector<8x8xf32>
    %118 = arith.mulf %117, %101 : vector<8x8xf32>
    %119 = arith.truncf %112 : vector<8x8xf32> to vector<8x8xbf16>
    %cst_43 = arith.constant dense<0.000000e+00> : vector<8x8xf32>
    %120 = tpu.matmul %119, %103, %cst_43 {dimension_numbers = #tpu.dot_dimension_numbers<[1], [0], [0], [1], [0, 0, 1, 1], [], []>} : vector<8x8xbf16>, vector<8x8xbf16>, vector<8x8xf32> -> vector<8x8xf32>
    %121 = arith.addf %118, %120 : vector<8x8xf32>
    %122 = vector.broadcast %116 : vector<8x1xf32> to vector<8x8xf32>
    %123 = arith.divf %121, %122 : vector<8x8xf32>
    %c0_44 = arith.constant 0 : index
    %c24 = arith.constant 24 : index
    %124 = vector.load %arg10[%c0_44, %c24] : memref<8x32xf32, #tpu.memory_space<vmem>>, vector<8x8xf32>
    tpu.vector_store %arg10[%c0_44, %c24], %123 {strides = array<i32>} : memref<8x32xf32, #tpu.memory_space<vmem>>, vector<8x8xf32>,
    %c0_45 = arith.constant 0 : index
    %c0_46 = arith.constant 0 : index
    %125 = vector.load %arg10[%c0_45, %c0_46] : memref<8x32xf32, #tpu.memory_space<vmem>>, vector<8x32xf32>
    %126 = arith.truncf %125 : vector<8x32xf32> to vector<8x32xbf16>
    %c0_47 = arith.constant 0 : index
    %c0_48 = arith.constant 0 : index
    %127 = vector.load %arg7[%c0_47, %c0_48] : memref<32x32xbf16, #tpu.memory_space<vmem>>, vector<32x32xbf16>
    %cst_49 = arith.constant dense<0.000000e+00> : vector<8x32xf32>
    %128 = tpu.matmul %126, %127, %cst_49 {dimension_numbers = #tpu.dot_dimension_numbers<[1], [0], [0], [1], [0, 0, 1, 1], [], []>} : vector<8x32xbf16>, vector<32x32xbf16>, vector<8x32xf32> -> vector<8x32xf32>
    %c0_50 = arith.constant 0 : index
    %c0_51 = arith.constant 0 : index
    %129 = vector.load %arg8[%c0_50, %c0_51] : memref<1x32xf32, #tpu.memory_space<vmem>>, vector<1x32xf32>
    %130 = vector.broadcast %129 : vector<1x32xf32> to vector<8x32xf32>
    %131 = arith.addf %128, %130 : vector<8x32xf32>
    %c0_52 = arith.constant 0 : index
    %c0_53 = arith.constant 0 : index
    %132 = vector.load %arg9[%c0_52, %c0_53] : memref<8x32xf32, #tpu.memory_space<vmem>>, vector<8x32xf32>
    tpu.vector_store %arg9[%c0_52, %c0_53], %131 {strides = array<i32>} : memref<8x32xf32, #tpu.memory_space<vmem>>, vector<8x32xf32>,
    return
  }
  func.func @transform_0(%arg0: i32) -> (i32, i32) {
    %c0_i32 = arith.constant 0 : i32
    %c0_i32_0 = arith.constant 0 : i32
    return %arg0, %c0_i32 : i32, i32
  }
  func.func @transform_1(%arg0: i32) -> (i32, i32) {
    %c0_i32 = arith.constant 0 : i32
    %c0_i32_0 = arith.constant 0 : i32
    return %arg0, %c0_i32 : i32, i32
  }
  func.func @transform_2(%arg0: i32) -> (i32, i32) {
    %c0_i32 = arith.constant 0 : i32
    %c0_i32_0 = arith.constant 0 : i32
    %c0_i32_1 = arith.constant 0 : i32
    return %c0_i32, %c0_i32_0 : i32, i32
  }
  func.func @transform_3(%arg0: i32) -> (i32, i32) {
    %c0_i32 = arith.constant 0 : i32
    %c0_i32_0 = arith.constant 0 : i32
    %c0_i32_1 = arith.constant 0 : i32
    return %c0_i32, %c0_i32_0 : i32, i32
  }
  func.func @transform_4(%arg0: i32) -> (i32, i32) {
    %c0_i32 = arith.constant 0 : i32
    %c0_i32_0 = arith.constant 0 : i32
    %c0_i32_1 = arith.constant 0 : i32
    return %c0_i32, %c0_i32_0 : i32, i32
  }
  func.func @transform_5(%arg0: i32) -> (i32, i32) {
    %c0_i32 = arith.constant 0 : i32
    %c0_i32_0 = arith.constant 0 : i32
    %c0_i32_1 = arith.constant 0 : i32
    return %c0_i32, %c0_i32_0 : i32, i32
  }
  func.func @transform_6(%arg0: i32) -> (i32, i32) {
    %c0_i32 = arith.constant 0 : i32
    %c0_i32_0 = arith.constant 0 : i32
    %c0_i32_1 = arith.constant 0 : i32
    return %c0_i32, %c0_i32_0 : i32, i32
  }
  func.func @transform_7(%arg0: i32) -> (i32, i32) {
    %c0_i32 = arith.constant 0 : i32
    %c0_i32_0 = arith.constant 0 : i32
    %c0_i32_1 = arith.constant 0 : i32
    return %c0_i32, %c0_i32_0 : i32, i32
  }
  func.func @transform_8(%arg0: i32) -> (i32, i32) {
    %c0_i32 = arith.constant 0 : i32
    %c0_i32_0 = arith.constant 0 : i32
    return %arg0, %c0_i32 : i32, i32
  }
}

module attributes {stable_mosaic.version = 11 : i64} {
  func.func @_fusion_kernel(%arg0: i32, %arg1: memref<8x32xbf16, #tpu.memory_space<vmem>>, %arg2: memref<8x32xbf16, #tpu.memory_space<vmem>>, %arg3: memref<32x32xbf16, #tpu.memory_space<vmem>>, %arg4: memref<1x32xf32, #tpu.memory_space<vmem>>, %arg5: memref<32x64xbf16, #tpu.memory_space<vmem>>, %arg6: memref<1x64xf32, #tpu.memory_space<vmem>>, %arg7: memref<32x32xbf16, #tpu.memory_space<vmem>>, %arg8: memref<1x32xf32, #tpu.memory_space<vmem>>, %arg9: memref<8x32xf32, #tpu.memory_space<vmem>>, %arg10: memref<8x32xf32, #tpu.memory_space<vmem>>) attributes {dimension_semantics = [#tpu.dimension_semantics<parallel>], iteration_bounds = array<i64: 2>, scalar_prefetch = 0 : i64, scratch_operands = 1 : i64, tpu.core_type = #tpu.core_type<tc>, window_params = [{transform_indices = @transform_0, window_bounds = array<i64: 8, 32>}, {transform_indices = @transform_1, window_bounds = array<i64: 8, 32>}, {pipeline_mode = #tpu.pipeline_mode<synchronous>, transform_indices = @transform_2, window_bounds = array<i64: 32, 32>}, {pipeline_mode = #tpu.pipeline_mode<synchronous>, transform_indices = @transform_3, window_bounds = array<i64: 1, 32>}, {pipeline_mode = #tpu.pipeline_mode<synchronous>, transform_indices = @transform_4, window_bounds = array<i64: 32, 64>}, {pipeline_mode = #tpu.pipeline_mode<synchronous>, transform_indices = @transform_5, window_bounds = array<i64: 1, 64>}, {pipeline_mode = #tpu.pipeline_mode<synchronous>, transform_indices = @transform_6, window_bounds = array<i64: 32, 32>}, {pipeline_mode = #tpu.pipeline_mode<synchronous>, transform_indices = @transform_7, window_bounds = array<i64: 1, 32>}, {transform_indices = @transform_8, window_bounds = array<i64: 8, 32>}]} {
    %c0 = arith.constant 0 : index
    %c0_0 = arith.constant 0 : index
    %0 = vector.load %arg1[%c0, %c0_0] : memref<8x32xbf16, #tpu.memory_space<vmem>>, vector<8x32xbf16>
    %c0_1 = arith.constant 0 : index
    %c0_2 = arith.constant 0 : index
    %1 = vector.load %arg3[%c0_1, %c0_2] : memref<32x32xbf16, #tpu.memory_space<vmem>>, vector<32x32xbf16>
    %cst = arith.constant dense<0.000000e+00> : vector<8x32xf32>
    %2 = tpu.matmul %0, %1, %cst {dimension_numbers = #tpu.dot_dimension_numbers<[1], [0], [0], [1], [0, 0, 1, 1], [], []>} : vector<8x32xbf16>, vector<32x32xbf16>, vector<8x32xf32> -> vector<8x32xf32>
    %c0_3 = arith.constant 0 : index
    %c0_4 = arith.constant 0 : index
    %3 = vector.load %arg4[%c0_3, %c0_4] : memref<1x32xf32, #tpu.memory_space<vmem>>, vector<1x32xf32>
    %4 = vector.broadcast %3 : vector<1x32xf32> to vector<8x32xf32>
    %5 = arith.addf %2, %4 : vector<8x32xf32>
    %c0_5 = arith.constant 0 : index
    %c0_6 = arith.constant 0 : index
    %6 = vector.load %arg2[%c0_5, %c0_6] : memref<8x32xbf16, #tpu.memory_space<vmem>>, vector<8x32xbf16>
    %c0_7 = arith.constant 0 : index
    %c0_8 = arith.constant 0 : index
    %7 = vector.load %arg5[%c0_7, %c0_8] : memref<32x64xbf16, #tpu.memory_space<vmem>>, vector<32x64xbf16>
    %cst_9 = arith.constant dense<0.000000e+00> : vector<8x64xf32>
    %8 = tpu.matmul %6, %7, %cst_9 {dimension_numbers = #tpu.dot_dimension_numbers<[1], [0], [0], [1], [0, 0, 1, 1], [], []>} : vector<8x32xbf16>, vector<32x64xbf16>, vector<8x64xf32> -> vector<8x64xf32>
    %c0_10 = arith.constant 0 : index
    %c0_11 = arith.constant 0 : index
    %9 = vector.load %arg6[%c0_10, %c0_11] : memref<1x64xf32, #tpu.memory_space<vmem>>, vector<1x64xf32>
    %10 = vector.broadcast %9 : vector<1x64xf32> to vector<8x64xf32>
    %11 = arith.addf %8, %10 : vector<8x64xf32>
    %12 = arith.truncf %5 : vector<8x32xf32> to vector<8x32xbf16>
    %13 = vector.extract_strided_slice %11 {offsets = [0, 0], sizes = [8, 32], strides = [1, 1]} : vector<8x64xf32> to vector<8x32xf32>
    %14 = arith.truncf %13 : vector<8x32xf32> to vector<8x32xbf16>
    %15 = vector.extract_strided_slice %11 {offsets = [0, 32], sizes = [8, 32], strides = [1, 1]} : vector<8x64xf32> to vector<8x32xf32>
    %16 = arith.truncf %15 : vector<8x32xf32> to vector<8x32xbf16>
    %17 = vector.extract_strided_slice %12 {offsets = [0, 0], sizes = [8, 8], strides = [1, 1]} : vector<8x32xbf16> to vector<8x8xbf16>
    %cst_12 = arith.constant 0xFF800000 : f32
    %18 = vector.broadcast %cst_12 : f32 to vector<8x1xf32>
    %cst_13 = arith.constant 0.000000e+00 : f32
    %19 = vector.broadcast %cst_13 : f32 to vector<8x1xf32>
    %cst_14 = arith.constant 0.000000e+00 : f32
    %20 = vector.broadcast %cst_14 : f32 to vector<8x8xf32>
    %21 = vector.extract_strided_slice %14 {offsets = [0, 0], sizes = [8, 8], strides = [1, 1]} : vector<8x32xbf16> to vector<8x8xbf16>
    %22 = vector.extract_strided_slice %16 {offsets = [0, 0], sizes = [8, 8], strides = [1, 1]} : vector<8x32xbf16> to vector<8x8xbf16>
    %cst_15 = arith.constant dense<0.000000e+00> : vector<8x8xf32>
    %23 = tpu.matmul %17, %21, %cst_15 {dimension_numbers = #tpu.dot_dimension_numbers<[1], [1], [0], [0], [0, 0, 1, 0], [], []>} : vector<8x8xbf16>, vector<8x8xbf16>, vector<8x8xf32> -> vector<8x8xf32>
    %cst_16 = arith.constant dense<0xFF800000> : vector<8xf32>
    %24 = vector.multi_reduction <maximumf>, %23, %cst_16 [1] : vector<8x8xf32> to vector<8xf32>
    %25 = vector.shape_cast %24 : vector<8xf32> to vector<8x1xf32>
    %26 = arith.maximumf %18, %25 : vector<8x1xf32>
    %27 = arith.subf %18, %26 : vector<8x1xf32>
    %28 = math.exp %27 : vector<8x1xf32>
    %29 = vector.broadcast %26 : vector<8x1xf32> to vector<8x8xf32>
    %30 = arith.subf %23, %29 : vector<8x8xf32>
    %31 = math.exp %30 : vector<8x8xf32>
    %32 = arith.mulf %28, %19 : vector<8x1xf32>
    %cst_17 = arith.constant dense<0.000000e+00> : vector<8xf32>
    %33 = vector.multi_reduction <add>, %31, %cst_17 [1] : vector<8x8xf32> to vector<8xf32>
    %34 = vector.shape_cast %33 : vector<8xf32> to vector<8x1xf32>
    %35 = arith.addf %32, %34 : vector<8x1xf32>
    %36 = vector.broadcast %28 : vector<8x1xf32> to vector<8x8xf32>
    %37 = arith.mulf %36, %20 : vector<8x8xf32>
    %38 = arith.truncf %31 : vector<8x8xf32> to vector<8x8xbf16>
    %cst_18 = arith.constant dense<0.000000e+00> : vector<8x8xf32>
    %39 = tpu.matmul %38, %22, %cst_18 {dimension_numbers = #tpu.dot_dimension_numbers<[1], [0], [0], [1], [0, 0, 1, 1], [], []>} : vector<8x8xbf16>, vector<8x8xbf16>, vector<8x8xf32> -> vector<8x8xf32>
    %40 = arith.addf %37, %39 : vector<8x8xf32>
    %41 = vector.broadcast %35 : vector<8x1xf32> to vector<8x8xf32>
    %42 = arith.divf %40, %41 : vector<8x8xf32>
    %c0_19 = arith.constant 0 : index
    %c0_20 = arith.constant 0 : index
    %43 = vector.load %arg10[%c0_19, %c0_20] : memref<8x32xf32, #tpu.memory_space<vmem>>, vector<8x8xf32>
    tpu.vector_store %arg10[%c0_19, %c0_20], %42 {strides = array<i32>} : memref<8x32xf32, #tpu.memory_space<vmem>>, vector<8x8xf32>,
    %44 = vector.extract_strided_slice %12 {offsets = [0, 8], sizes = [8, 8], strides = [1, 1]} : vector<8x32xbf16> to vector<8x8xbf16>
    %cst_21 = arith.constant 0xFF800000 : f32
    %45 = vector.broadcast %cst_21 : f32 to vector<8x1xf32>
    %cst_22 = arith.constant 0.000000e+00 : f32
    %46 = vector.broadcast %cst_22 : f32 to vector<8x1xf32>
    %cst_23 = arith.constant 0.000000e+00 : f32
    %47 = vector.broadcast %cst_23 : f32 to vector<8x8xf32>
    %48 = vector.extract_strided_slice %14 {offsets = [0, 8], sizes = [8, 8], strides = [1, 1]} : vector<8x32xbf16> to vector<8x8xbf16>
    %49 = vector.extract_strided_slice %16 {offsets = [0, 8], sizes = [8, 8], strides = [1, 1]} : vector<8x32xbf16> to vector<8x8xbf16>
    %cst_24 = arith.constant dense<0.000000e+00> : vector<8x8xf32>
    %50 = tpu.matmul %44, %48, %cst_24 {dimension_numbers = #tpu.dot_dimension_numbers<[1], [1], [0], [0], [0, 0, 1, 0], [], []>} : vector<8x8xbf16>, vector<8x8xbf16>, vector<8x8xf32> -> vector<8x8xf32>
    %cst_25 = arith.constant dense<0xFF800000> : vector<8xf32>
    %51 = vector.multi_reduction <maximumf>, %50, %cst_25 [1] : vector<8x8xf32> to vector<8xf32>
    %52 = vector.shape_cast %51 : vector<8xf32> to vector<8x1xf32>
    %53 = arith.maximumf %45, %52 : vector<8x1xf32>
    %54 = arith.subf %45, %53 : vector<8x1xf32>
    %55 = math.exp %54 : vector<8x1xf32>
    %56 = vector.broadcast %53 : vector<8x1xf32> to vector<8x8xf32>
    %57 = arith.subf %50, %56 : vector<8x8xf32>
    %58 = math.exp %57 : vector<8x8xf32>
    %59 = arith.mulf %55, %46 : vector<8x1xf32>
    %cst_26 = arith.constant dense<0.000000e+00> : vector<8xf32>
    %60 = vector.multi_reduction <add>, %58, %cst_26 [1] : vector<8x8xf32> to vector<8xf32>
    %61 = vector.shape_cast %60 : vector<8xf32> to vector<8x1xf32>
    %62 = arith.addf %59, %61 : vector<8x1xf32>
    %63 = vector.broadcast %55 : vector<8x1xf32> to vector<8x8xf32>
    %64 = arith.mulf %63, %47 : vector<8x8xf32>
    %65 = arith.truncf %58 : vector<8x8xf32> to vector<8x8xbf16>
    %cst_27 = arith.constant dense<0.000000e+00> : vector<8x8xf32>
    %66 = tpu.matmul %65, %49, %cst_27 {dimension_numbers = #tpu.dot_dimension_numbers<[1], [0], [0], [1], [0, 0, 1, 1], [], []>} : vector<8x8xbf16>, vector<8x8xbf16>, vector<8x8xf32> -> vector<8x8xf32>
    %67 = arith.addf %64, %66 : vector<8x8xf32>
    %68 = vector.broadcast %62 : vector<8x1xf32> to vector<8x8xf32>
    %69 = arith.divf %67, %68 : vector<8x8xf32>
    %c0_28 = arith.constant 0 : index
    %c8 = arith.constant 8 : index
    %70 = vector.load %arg10[%c0_28, %c8] : memref<8x32xf32, #tpu.memory_space<vmem>>, vector<8x8xf32>
    tpu.vector_store %arg10[%c0_28, %c8], %69 {strides = array<i32>} : memref<8x32xf32, #tpu.memory_space<vmem>>, vector<8x8xf32>,
    %71 = vector.extract_strided_slice %12 {offsets = [0, 16], sizes = [8, 8], strides = [1, 1]} : vector<8x32xbf16> to vector<8x8xbf16>
    %cst_29 = arith.constant 0xFF800000 : f32
    %72 = vector.broadcast %cst_29 : f32 to vector<8x1xf32>
    %cst_30 = arith.constant 0.000000e+00 : f32
    %73 = vector.broadcast %cst_30 : f32 to vector<8x1xf32>
    %cst_31 = arith.constant 0.000000e+00 : f32
    %74 = vector.broadcast %cst_31 : f32 to vector<8x8xf32>
    %75 = vector.extract_strided_slice %14 {offsets = [0, 16], sizes = [8, 8], strides = [1, 1]} : vector<8x32xbf16> to vector<8x8xbf16>
    %76 = vector.extract_strided_slice %16 {offsets = [0, 16], sizes = [8, 8], strides = [1, 1]} : vector<8x32xbf16> to vector<8x8xbf16>
    %cst_32 = arith.constant dense<0.000000e+00> : vector<8x8xf32>
    %77 = tpu.matmul %71, %75, %cst_32 {dimension_numbers = #tpu.dot_dimension_numbers<[1], [1], [0], [0], [0, 0, 1, 0], [], []>} : vector<8x8xbf16>, vector<8x8xbf16>, vector<8x8xf32> -> vector<8x8xf32>
    %cst_33 = arith.constant dense<0xFF800000> : vector<8xf32>
    %78 = vector.multi_reduction <maximumf>, %77, %cst_33 [1] : vector<8x8xf32> to vector<8xf32>
    %79 = vector.shape_cast %78 : vector<8xf32> to vector<8x1xf32>
    %80 = arith.maximumf %72, %79 : vector<8x1xf32>
    %81 = arith.subf %72, %80 : vector<8x1xf32>
    %82 = math.exp %81 : vector<8x1xf32>
    %83 = vector.broadcast %80 : vector<8x1xf32> to vector<8x8xf32>
    %84 = arith.subf %77, %83 : vector<8x8xf32>
    %85 = math.exp %84 : vector<8x8xf32>
    %86 = arith.mulf %82, %73 : vector<8x1xf32>
    %cst_34 = arith.constant dense<0.000000e+00> : vector<8xf32>
    %87 = vector.multi_reduction <add>, %85, %cst_34 [1] : vector<8x8xf32> to vector<8xf32>
    %88 = vector.shape_cast %87 : vector<8xf32> to vector<8x1xf32>
    %89 = arith.addf %86, %88 : vector<8x1xf32>
    %90 = vector.broadcast %82 : vector<8x1xf32> to vector<8x8xf32>
    %91 = arith.mulf %90, %74 : vector<8x8xf32>
    %92 = arith.truncf %85 : vector<8x8xf32> to vector<8x8xbf16>
    %cst_35 = arith.constant dense<0.000000e+00> : vector<8x8xf32>
    %93 = tpu.matmul %92, %76, %cst_35 {dimension_numbers = #tpu.dot_dimension_numbers<[1], [0], [0], [1], [0, 0, 1, 1], [], []>} : vector<8x8xbf16>, vector<8x8xbf16>, vector<8x8xf32> -> vector<8x8xf32>
    %94 = arith.addf %91, %93 : vector<8x8xf32>
    %95 = vector.broadcast %89 : vector<8x1xf32> to vector<8x8xf32>
    %96 = arith.divf %94, %95 : vector<8x8xf32>
    %c0_36 = arith.constant 0 : index
    %c16 = arith.constant 16 : index
    %97 = vector.load %arg10[%c0_36, %c16] : memref<8x32xf32, #tpu.memory_space<vmem>>, vector<8x8xf32>
    tpu.vector_store %arg10[%c0_36, %c16], %96 {strides = array<i32>} : memref<8x32xf32, #tpu.memory_space<vmem>>, vector<8x8xf32>,
    %98 = vector.extract_strided_slice %12 {offsets = [0, 24], sizes = [8, 8], strides = [1, 1]} : vector<8x32xbf16> to vector<8x8xbf16>
    %cst_37 = arith.constant 0xFF800000 : f32
    %99 = vector.broadcast %cst_37 : f32 to vector<8x1xf32>
    %cst_38 = arith.constant 0.000000e+00 : f32
    %100 = vector.broadcast %cst_38 : f32 to vector<8x1xf32>
    %cst_39 = arith.constant 0.000000e+00 : f32
    %101 = vector.broadcast %cst_39 : f32 to vector<8x8xf32>
    %102 = vector.extract_strided_slice %14 {offsets = [0, 24], sizes = [8, 8], strides = [1, 1]} : vector<8x32xbf16> to vector<8x8xbf16>
    %103 = vector.extract_strided_slice %16 {offsets = [0, 24], sizes = [8, 8], strides = [1, 1]} : vector<8x32xbf16> to vector<8x8xbf16>
    %cst_40 = arith.constant dense<0.000000e+00> : vector<8x8xf32>
    %104 = tpu.matmul %98, %102, %cst_40 {dimension_numbers = #tpu.dot_dimension_numbers<[1], [1], [0], [0], [0, 0, 1, 0], [], []>} : vector<8x8xbf16>, vector<8x8xbf16>, vector<8x8xf32> -> vector<8x8xf32>
    %cst_41 = arith.constant dense<0xFF800000> : vector<8xf32>
    %105 = vector.multi_reduction <maximumf>, %104, %cst_41 [1] : vector<8x8xf32> to vector<8xf32>
    %106 = vector.shape_cast %105 : vector<8xf32> to vector<8x1xf32>
    %107 = arith.maximumf %99, %106 : vector<8x1xf32>
    %108 = arith.subf %99, %107 : vector<8x1xf32>
    %109 = math.exp %108 : vector<8x1xf32>
    %110 = vector.broadcast %107 : vector<8x1xf32> to vector<8x8xf32>
    %111 = arith.subf %104, %110 : vector<8x8xf32>
    %112 = math.exp %111 : vector<8x8xf32>
    %113 = arith.mulf %109, %100 : vector<8x1xf32>
    %cst_42 = arith.constant dense<0.000000e+00> : vector<8xf32>
    %114 = vector.multi_reduction <add>, %112, %cst_42 [1] : vector<8x8xf32> to vector<8xf32>
    %115 = vector.shape_cast %114 : vector<8xf32> to vector<8x1xf32>
    %116 = arith.addf %113, %115 : vector<8x1xf32>
    %117 = vector.broadcast %109 : vector<8x1xf32> to vector<8x8xf32>
    %118 = arith.mulf %117, %101 : vector<8x8xf32>
    %119 = arith.truncf %112 : vector<8x8xf32> to vector<8x8xbf16>
    %cst_43 = arith.constant dense<0.000000e+00> : vector<8x8xf32>
    %120 = tpu.matmul %119, %103, %cst_43 {dimension_numbers = #tpu.dot_dimension_numbers<[1], [0], [0], [1], [0, 0, 1, 1], [], []>} : vector<8x8xbf16>, vector<8x8xbf16>, vector<8x8xf32> -> vector<8x8xf32>
    %121 = arith.addf %118, %120 : vector<8x8xf32>
    %122 = vector.broadcast %116 : vector<8x1xf32> to vector<8x8xf32>
    %123 = arith.divf %121, %122 : vector<8x8xf32>
    %c0_44 = arith.constant 0 : index
    %c24 = arith.constant 24 : index
    %124 = vector.load %arg10[%c0_44, %c24] : memref<8x32xf32, #tpu.memory_space<vmem>>, vector<8x8xf32>
    tpu.vector_store %arg10[%c0_44, %c24], %123 {strides = array<i32>} : memref<8x32xf32, #tpu.memory_space<vmem>>, vector<8x8xf32>,
    %c0_45 = arith.constant 0 : index
    %c0_46 = arith.constant 0 : index
    %125 = vector.load %arg10[%c0_45, %c0_46] : memref<8x32xf32, #tpu.memory_space<vmem>>, vector<8x32xf32>
    %126 = arith.truncf %125 : vector<8x32xf32> to vector<8x32xbf16>
    %c0_47 = arith.constant 0 : index
    %c0_48 = arith.constant 0 : index
    %127 = vector.load %arg7[%c0_47, %c0_48] : memref<32x32xbf16, #tpu.memory_space<vmem>>, vector<32x32xbf16>
    %cst_49 = arith.constant dense<0.000000e+00> : vector<8x32xf32>
    %128 = tpu.matmul %126, %127, %cst_49 {dimension_numbers = #tpu.dot_dimension_numbers<[1], [0], [0], [1], [0, 0, 1, 1], [], []>} : vector<8x32xbf16>, vector<32x32xbf16>, vector<8x32xf32> -> vector<8x32xf32>
    %c0_50 = arith.constant 0 : index
    %c0_51 = arith.constant 0 : index
    %129 = vector.load %arg8[%c0_50, %c0_51] : memref<1x32xf32, #tpu.memory_space<vmem>>, vector<1x32xf32>
    %130 = vector.broadcast %129 : vector<1x32xf32> to vector<8x32xf32>
    %131 = arith.addf %128, %130 : vector<8x32xf32>
    %c0_52 = arith.constant 0 : index
    %c0_53 = arith.constant 0 : index
    %132 = vector.load %arg9[%c0_52, %c0_53] : memref<8x32xf32, #tpu.memory_space<vmem>>, vector<8x32xf32>
    tpu.vector_store %arg9[%c0_52, %c0_53], %131 {strides = array<i32>} : memref<8x32xf32, #tpu.memory_space<vmem>>, vector<8x32xf32>,
    return
  }
  func.func @transform_0(%arg0: i32) -> (i32, i32) {
    %c0_i32 = arith.constant 0 : i32
    %c0_i32_0 = arith.constant 0 : i32
    return %arg0, %c0_i32 : i32, i32
  }
  func.func @transform_1(%arg0: i32) -> (i32, i32) {
    %c0_i32 = arith.constant 0 : i32
    %c0_i32_0 = arith.constant 0 : i32
    return %arg0, %c0_i32 : i32, i32
  }
  func.func @transform_2(%arg0: i32) -> (i32, i32) {
    %c0_i32 = arith.constant 0 : i32
    %c0_i32_0 = arith.constant 0 : i32
    %c0_i32_1 = arith.constant 0 : i32
    return %c0_i32, %c0_i32_0 : i32, i32
  }
  func.func @transform_3(%arg0: i32) -> (i32, i32) {
    %c0_i32 = arith.constant 0 : i32
    %c0_i32_0 = arith.constant 0 : i32
    %c0_i32_1 = arith.constant 0 : i32
    return %c0_i32, %c0_i32_0 : i32, i32
  }
  func.func @transform_4(%arg0: i32) -> (i32, i32) {
    %c0_i32 = arith.constant 0 : i32
    %c0_i32_0 = arith.constant 0 : i32
    %c0_i32_1 = arith.constant 0 : i32
    return %c0_i32, %c0_i32_0 : i32, i32
  }
  func.func @transform_5(%arg0: i32) -> (i32, i32) {
    %c0_i32 = arith.constant 0 : i32
    %c0_i32_0 = arith.constant 0 : i32
    %c0_i32_1 = arith.constant 0 : i32
    return %c0_i32, %c0_i32_0 : i32, i32
  }
  func.func @transform_6(%arg0: i32) -> (i32, i32) {
    %c0_i32 = arith.constant 0 : i32
    %c0_i32_0 = arith.constant 0 : i32
    %c0_i32_1 = arith.constant 0 : i32
    return %c0_i32, %c0_i32_0 : i32, i32
  }
  func.func @transform_7(%arg0: i32) -> (i32, i32) {
    %c0_i32 = arith.constant 0 : i32
    %c0_i32_0 = arith.constant 0 : i32
    %c0_i32_1 = arith.constant 0 : i32
    return %c0_i32, %c0_i32_0 : i32, i32
  }
  func.func @transform_8(%arg0: i32) -> (i32, i32) {
    %c0_i32 = arith.constant 0 : i32
    %c0_i32_0 = arith.constant 0 : i32
    return %arg0, %c0_i32 : i32, i32
  }
}

</mosaic_0001>

<bundles_post_ra>
// kernel: tpu_custom_call.1
= control target key start
LH: loop header
LB: loop body
LE: loop exit
PB: predicated region body
PF: predicated region fallthrough
CT: control target
= control target key end

     0   :  { %s2080_s0 = inlined_call_operand.hbm [shape: bf16[16,32], index: 0, kind: input, shape index: {}]   ;;  %s2081_s1 = inlined_call_operand.hbm [shape: bf16[16,32], index: 1, kind: input, shape index: {}]   ;;  %s2082_s2 = inlined_call_operand.hbm [shape: bf16[32,32], index: 2, kind: input, shape index: {}]   ;;  %s2083_s3 = inlined_call_operand.vmem [shape: f32[1,32], index: 3, kind: input, shape index: {}]   ;;  %s2084_s4 = inlined_call_operand.hbm [shape: bf16[32,64], index: 4, kind: input, shape index: {}]   ;;  %s2085_s5 = inlined_call_operand.vmem [shape: f32[1,64], index: 5, kind: input, shape index: {}]   ;;  %s2086_s6 = inlined_call_operand.hbm [shape: bf16[32,32], index: 6, kind: input, shape index: {}]   ;;  %s2087_s7 = inlined_call_operand.vmem [shape: f32[1,32], index: 7, kind: input, shape index: {}]   ;;  %s2088_s8 = inlined_call_operand.hbm [shape: f32[16,32], index: 8, kind: output, shape index: {}]  }
   0x1   :  { %2094 = sst [smem:[#allocation20_spill]] %s2082_s2 }
   0x2   :  { %2095 = sst [smem:[#allocation21_spill]] %s2084_s4 }
   0x3   :  { %2096 = sst [smem:[#allocation22_spill]] %s2086_s6 }
   0x4   :  { %13 = vsyncpa [#allocation4], 0 }
   0x5   :  { %15 = vsyncpa [#allocation4 + $0x1], 0 }
   0x6   :  { %16 = vsyncpa [#allocation7], 0 }
   0x7   :  { %18 = vsyncpa [#allocation7 + $0x1], 0 }
   0x8   :  { %19 = vsyncpa [#allocation10], 0 }
   0x9   :  { %20 = vsyncpa [#allocation5], 0 }
   0xa   :  { %22 = vsyncpa [#allocation5 + $0x1], 0  ;;  %s1767_s27 = smov 0   ;;  %s1769_s28 = smov 0  }
   0xb   :  { %s1771_s29 = smov 0   ;;  %s1773_s30 = smov 0  }
   0xc LB: > { %2097 = sst [smem:[#allocation18_spill]] %s1696_s29  ;;  %s1788_s9 = sadd.s32 4294967295, %s1700_s30   ;;  %s1700_s30 = sphi %s1773_s30, %s2122_s30   ;;  %s1696_s29 = sphi %s1771_s29, %s2119_s29   ;;  %s1692_s28 = sphi %s1769_s28, %s2121_s28   ;;  %s1688_s27 = sphi %s1767_s27, %s2120_s27  }
   0xd   : > { %s1226_s10 = sadd.s32 4294967294, %s1700_s30   ;;  %p48_p0 = scmp.ne.s32.totalorder %s1692_s28, %s1688_s27 }
   0xe   : > { %p2089_p1 = scmp.eq.s32.totalorder %s1788_s9, 0  ;;  %p230_p3 = scmp.eq.s32.totalorder %s1226_s10, 1 }
   0xf   : > { %p1227_p5 = scmp.ge.s32.totalorder %s1700_s30, 1  ;;  %p237_p7 = scmp.lt.s32.totalorder %s1700_s30, 3 }
  0x10   : > { %p1797_p4 = por %p2089_p1, %p48_p0  ;;  %p1802_p6 = por %p230_p3, %p48_p0 }
  0x11   : > { %p1807_p8 = pnand %p1227_p5, %p237_p7  ;;  %s1702_s14 = smov [#allocation8]  }
  0x12   : > { %s2098_s11 = scalar_select %p1797_p4, 1, 0 }
  0x13   : > { %s2099_s12 = scalar_select %p1802_p6, 1, 0 }
  0x14   : > { %s2100_s13 = scalar_select %p1807_p8, 1, 0 }
  0x15   : > { %s249_s15 = sshll.u32 %s1702_s14, 4  ;;  %p1382_p9 = pneg %p1807_p8  ;;  %s250_s15 = int_to_ptr.vmem [resolvable:$true] %s249_s15 }
  0x16   : > { %s1703_s17 = smov [#allocation9]   ;;  %s1704_s19 = smov [#allocation11]  }
  0x17   : > { %p1816_p11 = pnand %p1382_p9, %p2089_p1  ;;  %s265_s18 = sshll.u32 %s1703_s17, 4  ;;  %s266_s18 = int_to_ptr.vmem [resolvable:$true] %s265_s18 }
  0x18   : > { %s281_s20 = sshll.u32 %s1704_s19, 4  ;;  %s1501_s21 = scalar_lea.vmem %s250_s15, 256  ;;  %s282_s20 = int_to_ptr.vmem [resolvable:$true] %s281_s20 }
  0x19   : > { %p1492_p12 = pneg %p1816_p11  ;;  %p1502_p13 = scmp.ne.s32.totalorder %s250_s15, %s1501_s21 }
  0x1a   : > { %p1509_p5 = scmp.lt.s32.totalorder %s250_s15, %s250_s15  ;;  %p1510_p7 = scmp.lt.s32.totalorder %s1501_s21, %s1501_s21 }
  0x1b   : > { %p1504_p0 = pnand %p1502_p13, %p1492_p12 }
  0x1c   : > { %p1511_p9 = por %p1510_p7, %p1509_p5 }
  0x1d   : > { %p1505_p3 = pneg %p1504_p0 }
  0x1f   : > { %p1512_p10 = pnand %p1511_p9, %p1505_p3 }
  0x21   : > { %1515 = shalt.err (!%p1512_p10)
}
  0x22   : > { %s1705_s22 = smov 64   ;;  %s1706_s23 = smov 4  }
  0x23   : > { %s2102_s2 = sld [smem:[#allocation20_spill]]  ;;  %s1527_s26 = scalar_lea.vmem %s266_s18, 256 }
  0x24   : > { %p1528_p1 = scmp.ne.s32.totalorder %s266_s18, %s1527_s26  ;;  %p1535_p2 = scmp.lt.s32.totalorder %s266_s18, %s266_s18 }
  0x25   : > { %p1536_p6 = scmp.lt.s32.totalorder %s1527_s26, %s1527_s26 }
  0x26   : > { %p1530_p13 = pnand %p1528_p1, %p1492_p12 }
  0x27   : > { %p1537_p5 = por %p1536_p6, %p1535_p2 }
  0x28   : > { %p1531_p0 = pneg %p1530_p13 }
  0x29   : > { %1385 = dma.hbm_to_vmem [thread:$0]  (!%p1816_p11), %s2102_s2, 256, %s250_s15, [#allocation7], %s1705_s22, %s1705_s22, %s1706_s23  }
  0x2a   : > { %p1538_p3 = pnand %p1537_p5, %p1531_p0 }
  0x2c   : > { %1541 = shalt.err (!%p1538_p3)
}
  0x2d   : > { %s2103_s4 = sld [smem:[#allocation21_spill]]  ;;  %s1553_s15 = scalar_lea.vmem %s282_s20, 256 }
  0x2e   : > { %p1554_p10 = scmp.ne.s32.totalorder %s282_s20, %s1553_s15  ;;  %p1561_p9 = scmp.lt.s32.totalorder %s282_s20, %s282_s20 }
  0x2f   : > { %p1562_p13 = scmp.lt.s32.totalorder %s1553_s15, %s1553_s15 }
  0x30   : > { %p1556_p7 = pnand %p1554_p10, %p1492_p12 }
  0x31   : > { %p1563_p4 = por %p1562_p13, %p1561_p9 }
  0x32   : > { %p1557_p1 = pneg %p1556_p7 }
  0x33   : > { %1388 = dma.hbm_to_vmem [thread:$0]  (!%p1816_p11), %s2103_s4, 256, %s266_s18, [#allocation10], %s1705_s22, %s1705_s22, %s1706_s23  }
  0x34   : > { %p1564_p2 = pnand %p1563_p4, %p1557_p1 }
  0x36   : > { %1567 = shalt.err (!%p1564_p2)
}
  0x37   : > { %s2104_s6 = sld [smem:[#allocation22_spill]]  ;;  %s1847_s18 = sadd.s32 1, %s1700_s30  }
  0x38   : > { %s32_s21 = ssub.s32 %s1700_s30, %s1847_s18  ;;  %s35_s16 = sadd.s32 1, %s1696_s29 }
  0x39   : > { %p33_p4 = scmp.eq.s32.totalorder %s32_s21, 0  ;;  %p42_p6 = scmp.ne.s32.totalorder %s1696_s29, %s1692_s28 }
  0x3a   : > { %p43_p12 = scmp.eq.s32.totalorder %s1700_s30, 0  ;;  %p1406_p0 = scmp.lt.s32.totalorder %s1700_s30, 2 }
  0x3b   : > { %s1857_s24 = scalar_select %p33_p4, %s1696_s29, %s35_s16  }
  0x3c   : > { %p44_p5 = por %p43_p12, %p42_p6  ;;  %p2106_p3 = scmp.eq.s32.totalorder %s1788_s9, 1 }
  0x3d   : > { %1391 = dma.hbm_to_vmem [thread:$0]  (!%p1816_p11), %s2104_s6, 256, %s282_s20, [#allocation10], %s1705_s22, %s1705_s22, %s1706_s23  }
  0x3e   : > { %2105 = sst [smem:[#allocation19_spill]] %s1857_s24  ;;  %p1861_p10 = por %p2106_p3, %p42_p6 }
  0x3f   : > { %s298_s26 = sand.u32 1, %s1696_s29   ;;  %s1233_s10 = sshll.u32 %s1700_s30, 6 }
  0x40   : > { %s2107_s25 = scalar_select %p1861_p10, 1, 0 }
  0x41   : > { %s1867_s20 = sshll.u32 %s298_s26, 2  ;;  %s1872_s14 = scalar_lea.hbm %s2080_s0, %s1233_s10 }
  0x42   : > { %s302_s15 = scalar_lea.vmem [#allocation3], %s1867_s20  ;;  %p1875_p11 = pnand %p1406_p0, %p44_p5 }
  0x43   : > { %s309_s17 = sshll.u32 %s302_s15, 4  ;;  %s1882_s2 = scalar_lea.hbm %s2081_s1, %s1233_s10  ;;  %s310_s17 = int_to_ptr.vmem [resolvable:$true] %s309_s17 }
  0x44   : > { %s299_s22 = scalar_lea.sflag [#allocation4], %s298_s26  ;;  %s1568_s23 = scalar_lea.hbm %s1872_s14, 64 }
  0x45   : > { %p1569_p7 = scmp.ne.s32.totalorder %s1872_s14, %s1568_s23  ;;  %p1570_p1 = pneg %p1875_p11 }
  0x46   : > { %s1573_s6 = scalar_lea.hbm %s2080_s0, 128  ;;  %p1574_p2 = scmp.lt.s32.totalorder %s1872_s14, %s2080_s0 }
  0x47   : > { %p1571_p9 = pnand %p1570_p1, %p1569_p7  ;;  %p1575_p4 = scmp.lt.s32.totalorder %s1573_s6, %s1568_s23 }
  0x49   : > { %p1572_p13 = pneg %p1571_p9  ;;  %p1576_p6 = por %p1575_p4, %p1574_p2 }
  0x4b   : > { %p1577_p12 = pnand %p1576_p6, %p1572_p13 }
  0x4d   : > { %1580 = shalt.err (!%p1577_p12)
}
  0x4e   : > { %s1581_s26 = scalar_lea.vmem %s310_s17, 64  ;;  %s1707_s10 = smov [#allocation3]  }
  0x4f   : > { %p1582_p0 = scmp.ne.s32.totalorder %s310_s17, %s1581_s26  ;;  %s1586_s21 = sshll.u32 %s1707_s10, 4  ;;  %s1587_s21 = int_to_ptr.vmem [resolvable:$false] %s1586_s21 }
  0x50   : > { %s1588_s4 = scalar_lea.vmem %s1587_s21, 128  ;;  %p1589_p7 = scmp.lt.s32.totalorder %s310_s17, %s1587_s21 }
  0x51   : > { %p1584_p5 = pnand %p1582_p0, %p1570_p1  ;;  %p1590_p9 = scmp.lt.s32.totalorder %s1588_s4, %s1581_s26 }
  0x53   : > { %p1585_p3 = pneg %p1584_p5  ;;  %p1591_p10 = por %p1590_p9, %p1589_p7 }
  0x55   : > { %p1592_p8 = pnand %p1591_p10, %p1585_p3 }
  0x57   : > { %1595 = shalt.err (!%p1592_p8)
}
  0x58   : > { %1395 = dma.hbm_to_vmem [thread:$0]  (!%p1875_p11), %s1872_s14, 64, %s310_s17, %s299_s22  }
  0x59   : > { %s316_s6 = sand.u32 1, %s1700_s30   ;;  %s320_s29 = scalar_lea.vmem [#allocation6], %s1867_s20 }
  0x5a   : > { %s327_s24 = sshll.u32 %s320_s29, 4  ;;  %s317_s16 = scalar_lea.sflag [#allocation7], %s316_s6  ;;  %s328_s24 = int_to_ptr.vmem [resolvable:$true] %s327_s24 }
  0x5b   : > { %s1596_s23 = scalar_lea.hbm %s1882_s2, 64  ;;  %s1601_s10 = scalar_lea.hbm %s2081_s1, 128 }
  0x5c   : > { %p1597_p13 = scmp.ne.s32.totalorder %s1882_s2, %s1596_s23  ;;  %p1602_p2 = scmp.lt.s32.totalorder %s1882_s2, %s2081_s1 }
  0x5d   : > { %p1603_p4 = scmp.lt.s32.totalorder %s1601_s10, %s1596_s23 }
  0x5e   : > { %p1599_p8 = pnand %p1597_p13, %p1570_p1 }
  0x5f   : > { %p1604_p6 = por %p1603_p4, %p1602_p2 }
  0x60   : > { %p1600_p10 = pneg %p1599_p8 }
  0x62   : > { %p1605_p12 = pnand %p1604_p6, %p1600_p10 }
  0x64   : > { %1608 = shalt.err (!%p1605_p12)
}
  0x65   : > { %s1609_s20 = scalar_lea.vmem %s328_s24, 64  ;;  %s1708_s14 = smov [#allocation6]  }
  0x66   : > { %p1610_p0 = scmp.ne.s32.totalorder %s328_s24, %s1609_s20  ;;  %s1614_s17 = sshll.u32 %s1708_s14, 4  ;;  %s1615_s17 = int_to_ptr.vmem [resolvable:$false] %s1614_s17 }
  0x67   : > { %s1616_s22 = scalar_lea.vmem %s1615_s17, 128  ;;  %p1617_p7 = scmp.lt.s32.totalorder %s328_s24, %s1615_s17 }
  0x68   : > { %p1612_p5 = pnand %p1610_p0, %p1570_p1  ;;  %p1618_p9 = scmp.lt.s32.totalorder %s1616_s22, %s1609_s20 }
  0x6a   : > { %p1613_p3 = pneg %p1612_p5  ;;  %p1619_p13 = por %p1618_p9, %p1617_p7 }
  0x6c   : > { %p1620_p8 = pnand %p1619_p13, %p1613_p3 }
  0x6e   : > { %1623 = shalt.err (!%p1620_p8)
}
  0x6f   : > { %1398 = dma.hbm_to_vmem [thread:$0]  (!%p1875_p11), %s1882_s2, 64, %s328_s24, %s317_s16  }
  0x70   : > { %p2109_p10 = scmp.ne.s32.totalorder %s2100_s13, 0 }
  0x71   : > { %s1927_s6 = sand.u32 (!%p2109_p10), 1, %s1692_s28   ;;  %p2110_p1 = scmp.ne.s32.totalorder (!%p2109_p10), %s2098_s11, 0 }
  0x72   : > { %336 = sbr.rel (%p2109_p10) target bundleno = 1363 (0x553), region = 52  ;;  %s1237_s29 = sshll.u32 (!%p2109_p10), %s1927_s6, 2 }
  0x73   : > { %s339_s23 = scalar_lea.sflag (!%p2109_p10), [#allocation4], %s1927_s6  ;;  %s342_s15 = scalar_lea.vmem (!%p2109_p10), [#allocation3], %s1237_s29 }
  0x77   : > { %1667 = dma.done.wait (%p2110_p1), %s339_s23, 64  }
  0x78   : > { %1669 = vsyncadd (%p2110_p1), %s339_s23, 4294967232  ;;  %s347_s2 = sand.u32 1, %s1788_s9   ;;  %s351_s13 = scalar_lea.vmem [#allocation6], %s1237_s29 }
  0x79   : > { %s348_s19 = scalar_lea.sflag [#allocation7], %s347_s2 }
  0x7a   : > { %1671 = dma.done.wait (%p2110_p1), %s348_s19, 64  }
  0x7b   : > { %1673 = vsyncadd (%p2110_p1), %s348_s19, 4294967232  ;;  %p2111_p11 = scmp.eq.s32.totalorder %s1788_s9, 0 }
  0x7d   : > { %1675 = dma.done.wait (%p2111_p11), [#allocation7], 256   ;;  %p2112_p2 = pmov %p2111_p11 }
  0x7f   : > { %1677 = vsyncadd (%p2112_p2), [#allocation7], 4294967040  ;;  %p2113_p4 = pmov %p2112_p2 }
  0x80   : > { %p2114_p6 = pmov %p2112_p2 }
  0x81   : > { %1679 = dma.done.wait (%p2113_p4), [#allocation10], 512  }
  0x82   : > { %1681 = vsyncadd (%p2114_p6), [#allocation10], 4294966784  ;;  %v1709_v0 = vmov 0.0   ;;  %vm1710_vm0 = vmmov 0   ;;  %v1460_v1 = vld [vmem:[#allocation9 + $0x8] sm:$0xff]   ;;  %v1461_v2 = vld [vmem:[#allocation8 + $0x8] sm:$0xff]  }
  0x83   : > { %1300 = vmatprep.subr.bf16.mxu1 %v1709_v0  ;;  %1292 = vmatprep.subr.bf16.mxu0 %v1709_v0  ;;  %v1462_v3 = vld [vmem:[#allocation9] sm:$0xff]   ;;  %v1463_v4 = vld [vmem:[#allocation8] sm:$0xff]   ;;  %vm426_vm1 = vcmask 261120   ;;  %v470_v5 = vld [vmem:[%s351_s13] sm:$0xf]  ;;  %vm539_vm2 = vcmask 64512  }
  0x84   : > { %1304 = vmatprep.mubr.msk.bf16.mxu1 %vm1710_vm0, %v1709_v0  ;;  %1296 = vmatprep.mubr.msk.bf16.mxu0 %vm1710_vm0, %v1709_v0  ;;  %v402_v6 = vld [vmem:[%s342_s15] sm:$0xf]  ;;  %v1247_v7 = vld [vmem:[%s2085_s5] ss:$0 sm:$0xff]  ;;  %s1711_s10 = smov 112   ;;  %s1712_s21 = smov 120  }
  0x85   : > { %1301 = vmatpush3.bf16.msra.mxu1 %v1460_v1  ;;  %1293 = vmatpush3.bf16.msra.mxu0 %v1461_v2  ;;  %v1243_v8 = vld [vmem:[%s2083_s3] ss:$0 sm:$0xff]  ;;  %s1713_s4 = smov 104   ;;  %s1714_s20 = smov 96   ;;  %vm607_vm3 = vcmask 1043456   ;;  %vm776_vm4 = vcmask 130112  }
  0x86   : > { %1302 = vmatprep.subr.bf16.mxu1 %v1709_v0  ;;  %1294 = vmatprep.subr.bf16.mxu0 %v1709_v0  ;;  %s1715_s14 = smov 80   ;;  %s1716_s17 = smov 72   ;;  %vm898_vm5 = vcmask 195712   ;;  %vm1020_vm6 = vcmask 261312  }
  0x87   : > { %s1717_s22 = smov 88   ;;  %s1718_s29 = smov 8  }
  0x88   : > { %s1719_s23 = smov 16   ;;  %s1720_s15 = smov 24  }
  0x89   : > { %1303 = vmatpush3.bf16.msra.mxu1 %v1462_v3  ;;  %1295 = vmatpush3.bf16.msra.mxu0 %v1463_v4  ;;  %s1242_s2 = sshll.u32 %s1927_s6, 3  ;;  %s1264_s11 = sshll.u32 %s1788_s9, 7 }
  0x8a   : > { %1314 = vmatprep.subr.bf16.mxu1 %v1709_v0  ;;  %1308 = vmatprep.subr.bf16.mxu0 %v1709_v0  ;;  %s400_s24 = scalar_lea.vmem [#allocation12], %s1242_s2  ;;  %p2115_p0 = scmp.ne.s32.totalorder %s2107_s25, 0 }
  0x8b   : > { %s1105_s16 = sshll.u32 %s400_s24, 4  ;;  %s2038_s16 = int_to_ptr.vmem [resolvable:$true] %s1105_s16 }
  0x8c   : > { %1305 = vmatmul.mubr.msk.bf16.vlgmr.msra.gmra.mxu1 %vm426_vm1, %v470_v5  ;;  %1297 = vmatmul.mubr.msk.bf16.vlgmr.msra.gmra.mxu0 %vm426_vm1, %v402_v6  ;;  %s1624_s9 = scalar_lea.vmem %s2038_s16, 128 }
  0x8d   : > { %1316 = vmatprep.mubr.msk.bf16.mxu1 %vm1710_vm0, %v1709_v0  ;;  %1310 = vmatprep.mubr.msk.bf16.mxu0 %vm1710_vm0, %v1709_v0  ;;  %p1625_p12 = scmp.ne.s32.totalorder %s2038_s16, %s1624_s9 }
  0x8f   : > { %p1626_p5 = pnand %p1625_p12, %p2115_p0 }
  0x91   : > { %p1627_p3 = pneg %p1626_p5 }
 0x14c   : > { %v531_v9 = vpop.f32.mrf.mxu1  ;;  %v464_v11 = vpop.f32.mrf.mxu0 }
 0x14d   : > { %v532_v10 = vadd.f32 %v1247_v7, %v531_v9  ;;  %v465_v12 = vadd.f32 %v1243_v8, %v464_v11 }
 0x14e   : > { %v1306_v13 = vpop.f32.mrf.mxu1  ;;  %v1298_v15 = vpop.f32.mrf.mxu0 }
 0x14f   : > { %v1970_v14 = vpack.c.bf16 %v532_v10, %v532_v10  ;;  %v537_v17 = vpack.c.bf16 %v465_v12, %v465_v12 }
 0x150   : > { %v534_v16 = vpop.f32.mrf.mxu1  ;;  %v467_v18 = vpop.f32.mrf.mxu0 }
 0x151   : > { %780 = vrot.lane.b32.xlu1 %v1970_v14, %s1711_s10  ;;  %658 = vrot.lane.b32.xlu0 %v1970_v14, %s1712_s21  ;;  %v544_v19 = vsel %vm539_vm2, %v1970_v14, 0 }
 0x152   : > { %v1307_v20 = vpop.f32.mrf.mxu1  ;;  %1309 = vmatpush3.bf16.xpose.msra.mxu0 %v544_v19  ;;  %v1299_v21 = vpop.f32.mrf.mxu0 }
 0x153   : > { %1320 = vmatprep.subr.bf16.mxu0 %v1709_v0 }
 0x155   : > { %778 = vrot.lane.b32.xlu1 %v537_v17, %s1711_s10  ;;  %656 = vrot.lane.b32.xlu0 %v537_v17, %s1712_s21  ;;  %s2036_s21 = scalar_lea.hbm %s2088_s8, %s1264_s11 }
 0x159   : > { %900 = vrot.lane.b32.xlu1 %v537_v17, %s1713_s4  ;;  %902 = vrot.lane.b32.xlu0 %v1970_v14, %s1713_s4  ;;  %s1092_s4 = scalar_lea.sflag [#allocation5], %s1927_s6 }
 0x15a   : > { %1311 = vmatmul.mubr.msk.bf16.vlgmr.msra.gmra.mxu0 %vm539_vm2, %v537_v17 }
 0x15b   : > { %1322 = vmatprep.mubr.msk.bf16.mxu0 %vm1710_vm0, %v1709_v0 }
 0x15d   : > { %602 = vrot.lane.b32.xlu1 %v1970_v14, %s1714_s20  ;;  %s1721_s20 = smov [#allocation12]  }
 0x1c3   : > { %v781_v22 = vpop.permute.xlu1 %780  ;;  %v659_v23 = vpop.permute.xlu0 %658 }
 0x1c4   : > { %v664_v24 = vsel %vm539_vm2, %v659_v23, 0  ;;  %v786_v28 = vsel %vm539_vm2, %v781_v22, 0 }
 0x1c5   : > { %1321 = vmatpush3.bf16.xpose.msra.mxu0 %v664_v24 }
 0x1c6   : > { %1332 = vmatprep.subr.bf16.mxu0 %v1709_v0 }
 0x1c7   : > { %v779_v25 = vpop.permute.xlu1 %778  ;;  %v657_v26 = vpop.permute.xlu0 %656 }
 0x1cb   : > { %v901_v27 = vpop.permute.xlu1 %900  ;;  %v903_v31 = vpop.permute.xlu0 %902 }
 0x1cc   : > { %1323 = vmatmul.mubr.msk.bf16.vlgmr.msra.gmra.mxu0 %vm539_vm2, %v657_v26  ;;  %v908_v32 = vsel %vm539_vm2, %v903_v31, 0 }
 0x1cd   : > { %1333 = vmatpush3.bf16.xpose.msra.mxu0 %v786_v28  ;;  %1334 = vmatprep.mubr.msk.bf16.mxu0 %vm1710_vm0, %v1709_v0 }
 0x1ce   : > { %1344 = vmatprep.subr.bf16.mxu0 %v1709_v0 }
 0x1cf   : > { %v603_v29 = vpop.permute.xlu1 %602 }
 0x1d0   : > { %v609_v30 = vsel %vm607_vm3, %v603_v29, 0 }
 0x1d1   : > { %1315 = vmatpush3.bf16.msra.mxu1 %v609_v30 }
 0x1d2   : > { %1326 = vmatprep.subr.bf16.mxu1 %v1709_v0 }
 0x1d4   : > { %1335 = vmatmul.mubr.msk.bf16.vlgmr.msra.gmra.mxu0 %vm539_vm2, %v779_v25 }
 0x1d5   : > { %1345 = vmatpush3.bf16.xpose.msra.mxu0 %v908_v32  ;;  %1346 = vmatprep.mubr.msk.bf16.mxu0 %vm1710_vm0, %v1709_v0 }
 0x1d6   : > { %1356 = vmatprep.subr.bf16.mxu0 %v1709_v0 }
 0x1dc   : > { %1347 = vmatmul.mubr.msk.bf16.vlgmr.msra.gmra.mxu0 %vm539_vm2, %v901_v27 }
 0x1dd   : > { %1360 = vmatprep.mubr.msk.bf16.mxu0 %vm1710_vm0, %v1709_v0 }
 0x21a   : > { %v580_v33 = vpop.f32.mrf.mxu0 }
 0x21b   : > { %v586_v34 = vsel %vm539_vm2, %v580_v33, -inf }
 0x21c   : > { %587 = vmax.xlane.f32.xlu0 %v586_v34  ;;  %v1312_v35 = vpop.f32.mrf.mxu0 }
 0x21e   : > { %v583_v36 = vpop.f32.mrf.mxu0 }
 0x220   : > { %v1313_v37 = vpop.f32.mrf.mxu0 }
 0x28c   : > { %v700_v38 = vpop.f32.mrf.mxu0 }
 0x28d   : > { %v706_v39 = vsel %vm539_vm2, %v700_v38, -inf }
 0x28e   : > { %707 = vmax.xlane.f32.xlu1 %v706_v39  ;;  %v1324_v40 = vpop.f32.mrf.mxu0 }
 0x290   : > { %v703_v41 = vpop.f32.mrf.mxu0 }
 0x292   : > { %v1325_v42 = vpop.f32.mrf.mxu0 }
 0x294   : > { %v822_v43 = vpop.f32.mrf.mxu0 }
 0x295   : > { %v828_v44 = vsel %vm539_vm2, %v822_v43, -inf }
 0x296   : > { %829 = vmax.xlane.f32.xlu0 %v828_v44  ;;  %v1336_v45 = vpop.f32.mrf.mxu0 }
 0x298   : > { %v825_v46 = vpop.f32.mrf.mxu0 }
 0x29a   : > { %v1337_v47 = vpop.f32.mrf.mxu0 }
 0x29c   : > { %v944_v48 = vpop.f32.mrf.mxu0 }
 0x29d   : > { %v950_v49 = vsel %vm539_vm2, %v944_v48, -inf }
 0x29e   : > { %951 = vmax.xlane.f32.xlu0 %v950_v49  ;;  %v1348_v50 = vpop.f32.mrf.mxu0 }
 0x29f   : > { %843 = vrot.lane.b32.xlu1 %v1970_v14, %s1715_s14  ;;  %s1628_s14 = sshll.u32 %s1721_s20, 4  ;;  %s1629_s14 = int_to_ptr.vmem [resolvable:$false] %s1628_s14 }
 0x2a0   : > { %v947_v51 = vpop.f32.mrf.mxu0  ;;  %p1631_p7 = scmp.lt.s32.totalorder %s2038_s16, %s1629_s14 }
 0x2a2   : > { %v1349_v52 = vpop.f32.mrf.mxu0 }
 0x2a3   : > { %965 = vrot.lane.b32.xlu1 %v1970_v14, %s1716_s17  ;;  %s1630_s17 = scalar_lea.vmem %s1629_s14, 256 }
 0x2a4   : > { %p1632_p9 = scmp.lt.s32.totalorder %s1630_s17, %s1624_s9 }
 0x2a5   : > { %v588_v53 = vpop.xlane.xlu0 %587 }
 0x2a6   : > { %v592_v54 = vsub.f32 %v580_v33, %v588_v53  ;;  %v589_v24 = vsub.f32 -inf, %v588_v53  ;;  %p1633_p13 = por %p1632_p9, %p1631_p7 }
 0x2a8   : > { %v593_v55 = vmul.f32 1.442695, %v592_v54  ;;  %v590_v25 = vmul.f32 1.442695, %v589_v24  ;;  %p1634_p8 = pnand %p1633_p13, %p1627_p3 }
 0x2aa   : > { %1466 = vpow2.f32 %v593_v55 }
 0x2b4   : > { %721 = vrot.lane.b32.xlu0 %v1970_v14, %s1717_s22 }
 0x2b7   : > { %v1467_v56 = vpop.eup %1466 }
 0x2b8   : > { %v600_v57 = vpack.c.bf16 %v1467_v56, %v1467_v56  ;;  %v596_v19 = vsel %vm539_vm2, %v1467_v56, 0.0 }
 0x2ba   : > { %1317 = vmatmul.mubr.msk.bf16.vlgmr.msra.gmra.mxu1 %vm539_vm2, %v600_v57 }
 0x2bb   : > { %1328 = vmatprep.mubr.msk.bf16.mxu1 %vm1710_vm0, %v1709_v0 }
 0x317   : > { %v708_v58 = vpop.xlane.xlu1 %707 }
 0x318   : > { %v712_v59 = vsub.f32 %v700_v38, %v708_v58  ;;  %v709_v29 = vsub.f32 -inf, %v708_v58 }
 0x31a   : > { %v713_v60 = vmul.f32 1.442695, %v712_v59  ;;  %v710_v33 = vmul.f32 1.442695, %v709_v29  ;;  %v1464_v59 = vld [vmem:[#allocation11 + $0x8] sm:$0xff]  }
 0x31b   : > { %v844_v8 = vpop.permute.xlu1 %843  ;;  %1357 = vmatpush3.bf16.msra.mxu0 %v1464_v59 }
 0x31c   : > { %1468 = vpow2.f32 %v713_v60  ;;  %v849_v10 = vsel %vm607_vm3, %v844_v8, 0  ;;  %1358 = vmatprep.subr.bf16.mxu0 %v1709_v0 }
 0x31f   : > { %v830_v61 = vpop.xlane.xlu0 %829  ;;  %v966_v13 = vpop.permute.xlu1 %965 }
 0x320   : > { %v834_v62 = vsub.f32 %v822_v43, %v830_v61  ;;  %v971_v15 = vsel %vm607_vm3, %v966_v13, 0  ;;  %v831_v34 = vsub.f32 -inf, %v830_v61 }
 0x322   : > { %v835_v63 = vmul.f32 1.442695, %v834_v62  ;;  %v832_v35 = vmul.f32 1.442695, %v831_v34 }
 0x324   : > { %1470 = vpow2.f32 %v835_v63  ;;  %v1465_v63 = vld [vmem:[#allocation11] sm:$0xff]  }
 0x325   : > { %1359 = vmatpush3.bf16.msra.mxu0 %v1465_v63 }
 0x327   : > { %v952_v1 = vpop.xlane.xlu0 %951 }
 0x328   : > { %v956_v2 = vsub.f32 %v944_v48, %v952_v1  ;;  %v953_v36 = vsub.f32 -inf, %v952_v1 }
 0x329   : > { %v1469_v3 = vpop.eup %1468 }
 0x32a   : > { %v957_v4 = vmul.f32 1.442695, %v956_v2  ;;  %v716_v5 = vsel %vm539_vm2, %v1469_v3, 0.0  ;;  %v720_v9 = vpack.c.bf16 %v1469_v3, %v1469_v3  ;;  %v954_v40 = vmul.f32 1.442695, %v953_v36 }
 0x32b   : > { %v722_v6 = vpop.permute.xlu0 %721  ;;  %717 = vadd.xlane.f32.xlu0 %v716_v5 }
 0x32c   : > { %v727_v7 = vsel %vm607_vm3, %v722_v6, 0  ;;  %1472 = vpow2.f32 %v957_v4 }
 0x32d   : > { %1327 = vmatpush3.bf16.msra.mxu1 %v727_v7  ;;  %1474 = vpow2.f32 %v590_v25 }
 0x32e   : > { %1338 = vmatprep.subr.bf16.mxu1 %v1709_v0 }
 0x330   : > { %1329 = vmatmul.mubr.msk.bf16.vlgmr.msra.gmra.mxu1 %vm539_vm2, %v720_v9 }
 0x331   : > { %1339 = vmatpush3.bf16.msra.mxu1 %v849_v10  ;;  %1340 = vmatprep.mubr.msk.bf16.mxu1 %vm1710_vm0, %v1709_v0  ;;  %v1471_v11 = vpop.eup %1470 }
 0x332   : > { %1350 = vmatprep.subr.bf16.mxu1 %v1709_v0  ;;  %v838_v12 = vsel %vm539_vm2, %v1471_v11, 0.0  ;;  %v842_v14 = vpack.c.bf16 %v1471_v11, %v1471_v11 }
 0x333   : > { %839 = vadd.xlane.f32.xlu1 %v838_v12 }
 0x338   : > { %1341 = vmatmul.mubr.msk.bf16.vlgmr.msra.gmra.mxu1 %vm539_vm2, %v842_v14 }
 0x339   : > { %1351 = vmatpush3.bf16.msra.mxu1 %v971_v15  ;;  %1352 = vmatprep.mubr.msk.bf16.mxu1 %vm1710_vm0, %v1709_v0  ;;  %v1473_v16 = vpop.eup %1472  ;;  %v1259_v15 = vld [vmem:[%s2087_s7] ss:$0 sm:$0xff] }
 0x33a   : > { %v960_v17 = vsel %vm539_vm2, %v1473_v16, 0.0  ;;  %v964_v18 = vpack.c.bf16 %v1473_v16, %v1473_v16  ;;  %v1475_v27 = vpop.eup %1474 }
 0x33b   : > { %961 = vadd.xlane.f32.xlu0 %v960_v17  ;;  %v595_v30 = vmul.f32 0.0, %v1475_v27 }
 0x33f   : > { %597 = vadd.xlane.f32.xlu0 %v596_v19 }
 0x340   : > { %1353 = vmatmul.mubr.msk.bf16.vlgmr.msra.gmra.mxu1 %vm539_vm2, %v964_v18 }
 0x37a   : > { %v645_v20 = vpop.f32.mrf.mxu1 }
 0x37b   : > { %v651_v37 = vadd.f32 %v645_v20, %v595_v30 }
 0x37c   : > { %v1318_v21 = vpop.f32.mrf.mxu1 }
 0x37e   : > { %v648_v22 = vpop.f32.mrf.mxu1 }
 0x380   : > { %v1319_v23 = vpop.f32.mrf.mxu1 }
 0x3b4   : > { %v718_v26 = vpop.xlane.xlu0 %717 }
 0x3bc   : > { %v840_v45 = vpop.xlane.xlu1 %839 }
 0x3c4   : > { %v962_v28 = vpop.xlane.xlu0 %961 }
 0x3c8   : > { %v598_v31 = vpop.xlane.xlu0 %597 }
 0x3c9   : > { %v599_v32 = vadd.f32 %v598_v31, %v595_v30 }
 0x3cb   : > { %1476 = vrcp.f32 %v599_v32 }
 0x3cc   : > { %1478 = vpow2.f32 %v710_v33 }
 0x3cd   : > { %1480 = vpow2.f32 %v832_v35 }
 0x3ce   : > { %1482 = vpow2.f32 %v954_v40 }
 0x3d8   : > { %v1477_v38 = vpop.eup %1476 }
 0x3d9   : > { %v653_v39 = vmul.f32 %v1477_v38, %v651_v37  ;;  %v1479_v41 = vpop.eup %1478 }
 0x3da   : > { %v715_v42 = vmul.f32 0.0, %v1479_v41  ;;  %v1481_v44 = vpop.eup %1480 }
 0x3db   : > { %654 = vst.msk [vmem:[#allocation2] sm:$0xff] %vm539_vm2, %v653_v39  ;;  %v837_v46 = vmul.f32 0.0, %v1481_v44  ;;  %v1483_v48 = vpop.eup %1482 }
 0x3dc   : > { %v719_v43 = vadd.f32 %v718_v26, %v715_v42  ;;  %v959_v49 = vmul.f32 0.0, %v1483_v48 }
 0x3dd   : > { %v841_v47 = vadd.f32 %v840_v45, %v837_v46 }
 0x3de   : > { %1484 = vrcp.f32 %v719_v43  ;;  %v963_v51 = vadd.f32 %v962_v28, %v959_v49 }
 0x3df   : > { %1486 = vrcp.f32 %v841_v47 }
 0x3e0   : > { %1488 = vrcp.f32 %v963_v51 }
 0x3eb   : > { %v1485_v53 = vpop.eup %1484 }
 0x3ec   : > { %v1487_v61 = vpop.eup %1486 }
 0x3ed   : > { %v1489_v6 = vpop.eup %1488 }
 0x3f0   : > { %v763_v50 = vpop.f32.mrf.mxu1 }
 0x3f1   : > { %v769_v52 = vadd.f32 %v763_v50, %v715_v42 }
 0x3f2   : > { %v1330_v54 = vpop.f32.mrf.mxu1 }
 0x3f3   : > { %v771_v55 = vmul.f32 %v1485_v53, %v769_v52 }
 0x3f4   : > { %v766_v56 = vpop.f32.mrf.mxu1 }
 0x3f5   : > { %773 = vrot.lane.b32.xlu1 %v771_v55, %s1718_s29 }
 0x3f6   : > { %v1331_v57 = vpop.f32.mrf.mxu1 }
 0x3f8   : > { %v885_v58 = vpop.f32.mrf.mxu1 }
 0x3f9   : > { %v891_v60 = vadd.f32 %v885_v58, %v837_v46 }
 0x3fa   : > { %v1342_v62 = vpop.f32.mrf.mxu1 }
 0x3fb   : > { %v893_v1 = vmul.f32 %v1487_v61, %v891_v60 }
 0x3fc   : > { %v888_v2 = vpop.f32.mrf.mxu1 }
 0x3fd   : > { %895 = vrot.lane.b32.xlu0 %v893_v1, %s1719_s23 }
 0x3fe   : > { %v1343_v3 = vpop.f32.mrf.mxu1 }
 0x400   : > { %v1007_v4 = vpop.f32.mrf.mxu1 }
 0x401   : > { %v1013_v5 = vadd.f32 %v1007_v4, %v959_v49 }
 0x402   : > { %v1354_v7 = vpop.f32.mrf.mxu1 }
 0x403   : > { %v1015_v8 = vmul.f32 %v1489_v6, %v1013_v5 }
 0x404   : > { %v1010_v9 = vpop.f32.mrf.mxu1 }
 0x405   : > { %1017 = vrot.lane.b32.xlu1 %v1015_v8, %s1720_s15 }
 0x406   : > { %v1355_v10 = vpop.f32.mrf.mxu1 }
 0x467   : > { %v774_v11 = vpop.permute.xlu1 %773 }
 0x468   : > { %777 = vst.msk [vmem:[#allocation2] sm:$0xff] %vm776_vm4, %v774_v11 }
 0x46f   : > { %v896_v0 = vpop.permute.xlu0 %895 }
 0x470   : > { %899 = vst.msk [vmem:[#allocation2] sm:$0xff] %vm898_vm5, %v896_v0 }
 0x477   : > { %v1018_v12 = vpop.permute.xlu1 %1017 }
 0x478   : > { %1021 = vst.msk [vmem:[#allocation2] sm:$0xff] %vm1020_vm6, %v1018_v12 }
 0x47f   : > { %v1022_v13 = vld [vmem:[#allocation2] sm:$0xff] }
 0x480   : > { %v1023_v14 = vpack.c.bf16 %v1022_v13, %v1022_v13 }
 0x482   : > { %1361 = vmatmul.mubr.msk.bf16.vlgmr.msra.gmra.mxu0 %vm426_vm1, %v1023_v14 }
 0x542   : > { %v1084_v16 = vpop.f32.mrf.mxu0 }
 0x543   : > { %v1085_v17 = vadd.f32 %v1259_v15, %v1084_v16 }
 0x544   : > { %v1362_v18 = vpop.f32.mrf.mxu0 }
 0x545   : > { %1090 = vst.msk [vmem:[%s400_s24] sm:$0xff] %vm426_vm1, %v1085_v17 }
 0x546   : > { %v1087_v19 = vpop.f32.mrf.mxu0 }
 0x547   : > { %1637 = shalt.err (!%p1634_p8)
}
 0x548   : > { %s1638_s22 = scalar_lea.hbm %s2036_s21, 128  ;;  %s1642_s23 = scalar_lea.hbm %s2088_s8, 256 }
 0x549   : > { %p1639_p10 = scmp.ne.s32.totalorder %s2036_s21, %s1638_s22  ;;  %p1643_p2 = scmp.lt.s32.totalorder %s2036_s21, %s2088_s8 }
 0x54a   : > { %p1644_p4 = scmp.lt.s32.totalorder %s1642_s23, %s1638_s22 }
 0x54b   : > { %p1640_p1 = pnand %p1639_p10, %p2115_p0 }
 0x54c   : > { %p1645_p6 = por %p1644_p4, %p1643_p2 }
 0x54d   : > { %p1641_p11 = pneg %p1640_p1 }
 0x54f   : > { %p1646_p12 = pnand %p1645_p6, %p1641_p11 }
 0x551   : > { %1649 = shalt.err (!%p1646_p12)
}
 0x552   : > { %1380 = dma.vmem_to_hbm [thread:$0]  (%p2115_p0), %s2038_s16, 128, %s2036_s21, %s1092_s4   ;;  %v1363_v20 = vpop.f32.mrf.mxu0 }
 0x553 PF: > { %s1117_s19 = sand.u32 1, %s1688_s27   ;;  %p2116_p5 = scmp.ne.s32.totalorder %s2099_s12, 0 }
 0x554   : > { %p2117_p3 = scmp.ge.s32.totalorder %s1700_s30, 2  ;;  %s1118_s13 = scalar_lea.sflag [#allocation5], %s1117_s19 }
 0x556   : > { %p1400_p7 = pnand %p2117_p3, %p2116_p5 }
 0x558   : > { %p1401_p9 = pneg %p1400_p7 }
 0x55a   : > { %1683 = dma.done.wait (%p1401_p9), %s1118_s13, 128  }
 0x55b   : > { %1685 = vsyncadd (%p1401_p9), %s1118_s13, 4294967168  ;;  %s2118_s11 = sld [smem:[#allocation18_spill]]  ;;  %p25_p13 = scmp.ge.s32.totalorder %s1847_s18, 4  }
 0x55c   : > { %s2119_s29 = sld [smem:[#allocation19_spill]]  ;;  %s2120_s27 = smov %s1692_s28 }
 0x55d   : > { %s2122_s30 = smov %s1847_s18  ;;  %27 = sbr.rel (!%p25_p13) target bundleno = 12 (0xc), region = 122 }
 0x561   : > { %s2121_s28 = smov %s2118_s11 }
 0x562   :  { %1123 = vsyncpa [#allocation4], 1 }
 0x563   :  { %1125 = vsyncpa [#allocation4 + $0x1], 1 }
 0x564   :  { %1126 = vsyncpa [#allocation7], 1 }
 0x565   :  { %1128 = vsyncpa [#allocation7 + $0x1], 1 }
 0x566   :  { %1129 = vsyncpa [#allocation10], 1 }
 0x567   :  { %1130 = vsyncpa [#allocation5], 1 }
 0x568   :  { %1132 = vsyncpa [#allocation5 + $0x1], 1 }

// kernel: tpu_custom_call.1
= control target key start
LH: loop header
LB: loop body
LE: loop exit
PB: predicated region body
PF: predicated region fallthrough
CT: control target
= control target key end

     0   :  { %s2080_s0 = inlined_call_operand.hbm [shape: bf16[16,32], index: 0, kind: input, shape index: {}]   ;;  %s2081_s1 = inlined_call_operand.hbm [shape: bf16[16,32], index: 1, kind: input, shape index: {}]   ;;  %s2082_s2 = inlined_call_operand.hbm [shape: bf16[32,32], index: 2, kind: input, shape index: {}]   ;;  %s2083_s3 = inlined_call_operand.vmem [shape: f32[1,32], index: 3, kind: input, shape index: {}]   ;;  %s2084_s4 = inlined_call_operand.hbm [shape: bf16[32,64], index: 4, kind: input, shape index: {}]   ;;  %s2085_s5 = inlined_call_operand.vmem [shape: f32[1,64], index: 5, kind: input, shape index: {}]   ;;  %s2086_s6 = inlined_call_operand.hbm [shape: bf16[32,32], index: 6, kind: input, shape index: {}]   ;;  %s2087_s7 = inlined_call_operand.vmem [shape: f32[1,32], index: 7, kind: input, shape index: {}]   ;;  %s2088_s8 = inlined_call_operand.hbm [shape: f32[16,32], index: 8, kind: output, shape index: {}]  }
   0x1   :  { %2094 = sst [smem:[#allocation20_spill]] %s2082_s2 }
   0x2   :  { %2095 = sst [smem:[#allocation21_spill]] %s2084_s4 }
   0x3   :  { %2096 = sst [smem:[#allocation22_spill]] %s2086_s6 }
   0x4   :  { %13 = vsyncpa [#allocation4], 0 }
   0x5   :  { %15 = vsyncpa [#allocation4 + $0x1], 0 }
   0x6   :  { %16 = vsyncpa [#allocation7], 0 }
   0x7   :  { %18 = vsyncpa [#allocation7 + $0x1], 0 }
   0x8   :  { %19 = vsyncpa [#allocation10], 0 }
   0x9   :  { %20 = vsyncpa [#allocation5], 0 }
   0xa   :  { %22 = vsyncpa [#allocation5 + $0x1], 0  ;;  %s1767_s27 = smov 0   ;;  %s1769_s28 = smov 0  }
   0xb   :  { %s1771_s29 = smov 0   ;;  %s1773_s30 = smov 0  }
   0xc LB: > { %2097 = sst [smem:[#allocation18_spill]] %s1696_s29  ;;  %s1788_s9 = sadd.s32 4294967295, %s1700_s30   ;;  %s1700_s30 = sphi %s1773_s30, %s2122_s30   ;;  %s1696_s29 = sphi %s1771_s29, %s2119_s29   ;;  %s1692_s28 = sphi %s1769_s28, %s2121_s28   ;;  %s1688_s27 = sphi %s1767_s27, %s2120_s27  }
   0xd   : > { %s1226_s10 = sadd.s32 4294967294, %s1700_s30   ;;  %p48_p0 = scmp.ne.s32.totalorder %s1692_s28, %s1688_s27 }
   0xe   : > { %p2089_p1 = scmp.eq.s32.totalorder %s1788_s9, 0  ;;  %p230_p3 = scmp.eq.s32.totalorder %s1226_s10, 1 }
   0xf   : > { %p1227_p5 = scmp.ge.s32.totalorder %s1700_s30, 1  ;;  %p237_p7 = scmp.lt.s32.totalorder %s1700_s30, 3 }
  0x10   : > { %p1797_p4 = por %p2089_p1, %p48_p0  ;;  %p1802_p6 = por %p230_p3, %p48_p0 }
  0x11   : > { %p1807_p8 = pnand %p1227_p5, %p237_p7  ;;  %s1702_s14 = smov [#allocation8]  }
  0x12   : > { %s2098_s11 = scalar_select %p1797_p4, 1, 0 }
  0x13   : > { %s2099_s12 = scalar_select %p1802_p6, 1, 0 }
  0x14   : > { %s2100_s13 = scalar_select %p1807_p8, 1, 0 }
  0x15   : > { %s249_s15 = sshll.u32 %s1702_s14, 4  ;;  %p1382_p9 = pneg %p1807_p8  ;;  %s250_s15 = int_to_ptr.vmem [resolvable:$true] %s249_s15 }
  0x16   : > { %s1703_s17 = smov [#allocation9]   ;;  %s1704_s19 = smov [#allocation11]  }
  0x17   : > { %p1816_p11 = pnand %p1382_p9, %p2089_p1  ;;  %s265_s18 = sshll.u32 %s1703_s17, 4  ;;  %s266_s18 = int_to_ptr.vmem [resolvable:$true] %s265_s18 }
  0x18   : > { %s281_s20 = sshll.u32 %s1704_s19, 4  ;;  %s1501_s21 = scalar_lea.vmem %s250_s15, 256  ;;  %s282_s20 = int_to_ptr.vmem [resolvable:$true] %s281_s20 }
  0x19   : > { %p1492_p12 = pneg %p1816_p11  ;;  %p1502_p13 = scmp.ne.s32.totalorder %s250_s15, %s1501_s21 }
  0x1a   : > { %p1509_p5 = scmp.lt.s32.totalorder %s250_s15, %s250_s15  ;;  %p1510_p7 = scmp.lt.s32.totalorder %s1501_s21, %s1501_s21 }
  0x1b   : > { %p1504_p0 = pnand %p1502_p13, %p1492_p12 }
  0x1c   : > { %p1511_p9 = por %p1510_p7, %p1509_p5 }
  0x1d   : > { %p1505_p3 = pneg %p1504_p0 }
  0x1f   : > { %p1512_p10 = pnand %p1511_p9, %p1505_p3 }
  0x21   : > { %1515 = shalt.err (!%p1512_p10)
}
  0x22   : > { %s1705_s22 = smov 64   ;;  %s1706_s23 = smov 4  }
  0x23   : > { %s2102_s2 = sld [smem:[#allocation20_spill]]  ;;  %s1527_s26 = scalar_lea.vmem %s266_s18, 256 }
  0x24   : > { %p1528_p1 = scmp.ne.s32.totalorder %s266_s18, %s1527_s26  ;;  %p1535_p2 = scmp.lt.s32.totalorder %s266_s18, %s266_s18 }
  0x25   : > { %p1536_p6 = scmp.lt.s32.totalorder %s1527_s26, %s1527_s26 }
  0x26   : > { %p1530_p13 = pnand %p1528_p1, %p1492_p12 }
  0x27   : > { %p1537_p5 = por %p1536_p6, %p1535_p2 }
  0x28   : > { %p1531_p0 = pneg %p1530_p13 }
  0x29   : > { %1385 = dma.hbm_to_vmem [thread:$0]  (!%p1816_p11), %s2102_s2, 256, %s250_s15, [#allocation7], %s1705_s22, %s1705_s22, %s1706_s23  }
  0x2a   : > { %p1538_p3 = pnand %p1537_p5, %p1531_p0 }
  0x2c   : > { %1541 = shalt.err (!%p1538_p3)
}
  0x2d   : > { %s2103_s4 = sld [smem:[#allocation21_spill]]  ;;  %s1553_s15 = scalar_lea.vmem %s282_s20, 256 }
  0x2e   : > { %p1554_p10 = scmp.ne.s32.totalorder %s282_s20, %s1553_s15  ;;  %p1561_p9 = scmp.lt.s32.totalorder %s282_s20, %s282_s20 }
  0x2f   : > { %p1562_p13 = scmp.lt.s32.totalorder %s1553_s15, %s1553_s15 }
  0x30   : > { %p1556_p7 = pnand %p1554_p10, %p1492_p12 }
  0x31   : > { %p1563_p4 = por %p1562_p13, %p1561_p9 }
  0x32   : > { %p1557_p1 = pneg %p1556_p7 }
  0x33   : > { %1388 = dma.hbm_to_vmem [thread:$0]  (!%p1816_p11), %s2103_s4, 256, %s266_s18, [#allocation10], %s1705_s22, %s1705_s22, %s1706_s23  }
  0x34   : > { %p1564_p2 = pnand %p1563_p4, %p1557_p1 }
  0x36   : > { %1567 = shalt.err (!%p1564_p2)
}
  0x37   : > { %s2104_s6 = sld [smem:[#allocation22_spill]]  ;;  %s1847_s18 = sadd.s32 1, %s1700_s30  }
  0x38   : > { %s32_s21 = ssub.s32 %s1700_s30, %s1847_s18  ;;  %s35_s16 = sadd.s32 1, %s1696_s29 }
  0x39   : > { %p33_p4 = scmp.eq.s32.totalorder %s32_s21, 0  ;;  %p42_p6 = scmp.ne.s32.totalorder %s1696_s29, %s1692_s28 }
  0x3a   : > { %p43_p12 = scmp.eq.s32.totalorder %s1700_s30, 0  ;;  %p1406_p0 = scmp.lt.s32.totalorder %s1700_s30, 2 }
  0x3b   : > { %s1857_s24 = scalar_select %p33_p4, %s1696_s29, %s35_s16  }
  0x3c   : > { %p44_p5 = por %p43_p12, %p42_p6  ;;  %p2106_p3 = scmp.eq.s32.totalorder %s1788_s9, 1 }
  0x3d   : > { %1391 = dma.hbm_to_vmem [thread:$0]  (!%p1816_p11), %s2104_s6, 256, %s282_s20, [#allocation10], %s1705_s22, %s1705_s22, %s1706_s23  }
  0x3e   : > { %2105 = sst [smem:[#allocation19_spill]] %s1857_s24  ;;  %p1861_p10 = por %p2106_p3, %p42_p6 }
  0x3f   : > { %s298_s26 = sand.u32 1, %s1696_s29   ;;  %s1233_s10 = sshll.u32 %s1700_s30, 6 }
  0x40   : > { %s2107_s25 = scalar_select %p1861_p10, 1, 0 }
  0x41   : > { %s1867_s20 = sshll.u32 %s298_s26, 2  ;;  %s1872_s14 = scalar_lea.hbm %s2080_s0, %s1233_s10 }
  0x42   : > { %s302_s15 = scalar_lea.vmem [#allocation3], %s1867_s20  ;;  %p1875_p11 = pnand %p1406_p0, %p44_p5 }
  0x43   : > { %s309_s17 = sshll.u32 %s302_s15, 4  ;;  %s1882_s2 = scalar_lea.hbm %s2081_s1, %s1233_s10  ;;  %s310_s17 = int_to_ptr.vmem [resolvable:$true] %s309_s17 }
  0x44   : > { %s299_s22 = scalar_lea.sflag [#allocation4], %s298_s26  ;;  %s1568_s23 = scalar_lea.hbm %s1872_s14, 64 }
  0x45   : > { %p1569_p7 = scmp.ne.s32.totalorder %s1872_s14, %s1568_s23  ;;  %p1570_p1 = pneg %p1875_p11 }
  0x46   : > { %s1573_s6 = scalar_lea.hbm %s2080_s0, 128  ;;  %p1574_p2 = scmp.lt.s32.totalorder %s1872_s14, %s2080_s0 }
  0x47   : > { %p1571_p9 = pnand %p1570_p1, %p1569_p7  ;;  %p1575_p4 = scmp.lt.s32.totalorder %s1573_s6, %s1568_s23 }
  0x49   : > { %p1572_p13 = pneg %p1571_p9  ;;  %p1576_p6 = por %p1575_p4, %p1574_p2 }
  0x4b   : > { %p1577_p12 = pnand %p1576_p6, %p1572_p13 }
  0x4d   : > { %1580 = shalt.err (!%p1577_p12)
}
  0x4e   : > { %s1581_s26 = scalar_lea.vmem %s310_s17, 64  ;;  %s1707_s10 = smov [#allocation3]  }
  0x4f   : > { %p1582_p0 = scmp.ne.s32.totalorder %s310_s17, %s1581_s26  ;;  %s1586_s21 = sshll.u32 %s1707_s10, 4  ;;  %s1587_s21 = int_to_ptr.vmem [resolvable:$false] %s1586_s21 }
  0x50   : > { %s1588_s4 = scalar_lea.vmem %s1587_s21, 128  ;;  %p1589_p7 = scmp.lt.s32.totalorder %s310_s17, %s1587_s21 }
  0x51   : > { %p1584_p5 = pnand %p1582_p0, %p1570_p1  ;;  %p1590_p9 = scmp.lt.s32.totalorder %s1588_s4, %s1581_s26 }
  0x53   : > { %p1585_p3 = pneg %p1584_p5  ;;  %p1591_p10 = por %p1590_p9, %p1589_p7 }
  0x55   : > { %p1592_p8 = pnand %p1591_p10, %p1585_p3 }
  0x57   : > { %1595 = shalt.err (!%p1592_p8)
}
  0x58   : > { %1395 = dma.hbm_to_vmem [thread:$0]  (!%p1875_p11), %s1872_s14, 64, %s310_s17, %s299_s22  }
  0x59   : > { %s316_s6 = sand.u32 1, %s1700_s30   ;;  %s320_s29 = scalar_lea.vmem [#allocation6], %s1867_s20 }
  0x5a   : > { %s327_s24 = sshll.u32 %s320_s29, 4  ;;  %s317_s16 = scalar_lea.sflag [#allocation7], %s316_s6  ;;  %s328_s24 = int_to_ptr.vmem [resolvable:$true] %s327_s24 }
  0x5b   : > { %s1596_s23 = scalar_lea.hbm %s1882_s2, 64  ;;  %s1601_s10 = scalar_lea.hbm %s2081_s1, 128 }
  0x5c   : > { %p1597_p13 = scmp.ne.s32.totalorder %s1882_s2, %s1596_s23  ;;  %p1602_p2 = scmp.lt.s32.totalorder %s1882_s2, %s2081_s1 }
  0x5d   : > { %p1603_p4 = scmp.lt.s32.totalorder %s1601_s10, %s1596_s23 }
  0x5e   : > { %p1599_p8 = pnand %p1597_p13, %p1570_p1 }
  0x5f   : > { %p1604_p6 = por %p1603_p4, %p1602_p2 }
  0x60   : > { %p1600_p10 = pneg %p1599_p8 }
  0x62   : > { %p1605_p12 = pnand %p1604_p6, %p1600_p10 }
  0x64   : > { %1608 = shalt.err (!%p1605_p12)
}
  0x65   : > { %s1609_s20 = scalar_lea.vmem %s328_s24, 64  ;;  %s1708_s14 = smov [#allocation6]  }
  0x66   : > { %p1610_p0 = scmp.ne.s32.totalorder %s328_s24, %s1609_s20  ;;  %s1614_s17 = sshll.u32 %s1708_s14, 4  ;;  %s1615_s17 = int_to_ptr.vmem [resolvable:$false] %s1614_s17 }
  0x67   : > { %s1616_s22 = scalar_lea.vmem %s1615_s17, 128  ;;  %p1617_p7 = scmp.lt.s32.totalorder %s328_s24, %s1615_s17 }
  0x68   : > { %p1612_p5 = pnand %p1610_p0, %p1570_p1  ;;  %p1618_p9 = scmp.lt.s32.totalorder %s1616_s22, %s1609_s20 }
  0x6a   : > { %p1613_p3 = pneg %p1612_p5  ;;  %p1619_p13 = por %p1618_p9, %p1617_p7 }
  0x6c   : > { %p1620_p8 = pnand %p1619_p13, %p1613_p3 }
  0x6e   : > { %1623 = shalt.err (!%p1620_p8)
}
  0x6f   : > { %1398 = dma.hbm_to_vmem [thread:$0]  (!%p1875_p11), %s1882_s2, 64, %s328_s24, %s317_s16  }
  0x70   : > { %p2109_p10 = scmp.ne.s32.totalorder %s2100_s13, 0 }
  0x71   : > { %s1927_s6 = sand.u32 (!%p2109_p10), 1, %s1692_s28   ;;  %p2110_p1 = scmp.ne.s32.totalorder (!%p2109_p10), %s2098_s11, 0 }
  0x72   : > { %336 = sbr.rel (%p2109_p10) target bundleno = 1363 (0x553), region = 52  ;;  %s1237_s29 = sshll.u32 (!%p2109_p10), %s1927_s6, 2 }
  0x73   : > { %s339_s23 = scalar_lea.sflag (!%p2109_p10), [#allocation4], %s1927_s6  ;;  %s342_s15 = scalar_lea.vmem (!%p2109_p10), [#allocation3], %s1237_s29 }
  0x77   : > { %1667 = dma.done.wait (%p2110_p1), %s339_s23, 64  }
  0x78   : > { %1669 = vsyncadd (%p2110_p1), %s339_s23, 4294967232  ;;  %s347_s2 = sand.u32 1, %s1788_s9   ;;  %s351_s13 = scalar_lea.vmem [#allocation6], %s1237_s29 }
  0x79   : > { %s348_s19 = scalar_lea.sflag [#allocation7], %s347_s2 }
  0x7a   : > { %1671 = dma.done.wait (%p2110_p1), %s348_s19, 64  }
  0x7b   : > { %1673 = vsyncadd (%p2110_p1), %s348_s19, 4294967232  ;;  %p2111_p11 = scmp.eq.s32.totalorder %s1788_s9, 0 }
  0x7d   : > { %1675 = dma.done.wait (%p2111_p11), [#allocation7], 256   ;;  %p2112_p2 = pmov %p2111_p11 }
  0x7f   : > { %1677 = vsyncadd (%p2112_p2), [#allocation7], 4294967040  ;;  %p2113_p4 = pmov %p2112_p2 }
  0x80   : > { %p2114_p6 = pmov %p2112_p2 }
  0x81   : > { %1679 = dma.done.wait (%p2113_p4), [#allocation10], 512  }
  0x82   : > { %1681 = vsyncadd (%p2114_p6), [#allocation10], 4294966784  ;;  %v1709_v0 = vmov 0.0   ;;  %vm1710_vm0 = vmmov 0   ;;  %v1460_v1 = vld [vmem:[#allocation9 + $0x8] sm:$0xff]   ;;  %v1461_v2 = vld [vmem:[#allocation8 + $0x8] sm:$0xff]  }
  0x83   : > { %1300 = vmatprep.subr.bf16.mxu1 %v1709_v0  ;;  %1292 = vmatprep.subr.bf16.mxu0 %v1709_v0  ;;  %v1462_v3 = vld [vmem:[#allocation9] sm:$0xff]   ;;  %v1463_v4 = vld [vmem:[#allocation8] sm:$0xff]   ;;  %vm426_vm1 = vcmask 261120   ;;  %v470_v5 = vld [vmem:[%s351_s13] sm:$0xf]  ;;  %vm539_vm2 = vcmask 64512  }
  0x84   : > { %1304 = vmatprep.mubr.msk.bf16.mxu1 %vm1710_vm0, %v1709_v0  ;;  %1296 = vmatprep.mubr.msk.bf16.mxu0 %vm1710_vm0, %v1709_v0  ;;  %v402_v6 = vld [vmem:[%s342_s15] sm:$0xf]  ;;  %v1247_v7 = vld [vmem:[%s2085_s5] ss:$0 sm:$0xff]  ;;  %s1711_s10 = smov 112   ;;  %s1712_s21 = smov 120  }
  0x85   : > { %1301 = vmatpush3.bf16.msra.mxu1 %v1460_v1  ;;  %1293 = vmatpush3.bf16.msra.mxu0 %v1461_v2  ;;  %v1243_v8 = vld [vmem:[%s2083_s3] ss:$0 sm:$0xff]  ;;  %s1713_s4 = smov 104   ;;  %s1714_s20 = smov 96   ;;  %vm607_vm3 = vcmask 1043456   ;;  %vm776_vm4 = vcmask 130112  }
  0x86   : > { %1302 = vmatprep.subr.bf16.mxu1 %v1709_v0  ;;  %1294 = vmatprep.subr.bf16.mxu0 %v1709_v0  ;;  %s1715_s14 = smov 80   ;;  %s1716_s17 = smov 72   ;;  %vm898_vm5 = vcmask 195712   ;;  %vm1020_vm6 = vcmask 261312  }
  0x87   : > { %s1717_s22 = smov 88   ;;  %s1718_s29 = smov 8  }
  0x88   : > { %s1719_s23 = smov 16   ;;  %s1720_s15 = smov 24  }
  0x89   : > { %1303 = vmatpush3.bf16.msra.mxu1 %v1462_v3  ;;  %1295 = vmatpush3.bf16.msra.mxu0 %v1463_v4  ;;  %s1242_s2 = sshll.u32 %s1927_s6, 3  ;;  %s1264_s11 = sshll.u32 %s1788_s9, 7 }
  0x8a   : > { %1314 = vmatprep.subr.bf16.mxu1 %v1709_v0  ;;  %1308 = vmatprep.subr.bf16.mxu0 %v1709_v0  ;;  %s400_s24 = scalar_lea.vmem [#allocation12], %s1242_s2  ;;  %p2115_p0 = scmp.ne.s32.totalorder %s2107_s25, 0 }
  0x8b   : > { %s1105_s16 = sshll.u32 %s400_s24, 4  ;;  %s2038_s16 = int_to_ptr.vmem [resolvable:$true] %s1105_s16 }
  0x8c   : > { %1305 = vmatmul.mubr.msk.bf16.vlgmr.msra.gmra.mxu1 %vm426_vm1, %v470_v5  ;;  %1297 = vmatmul.mubr.msk.bf16.vlgmr.msra.gmra.mxu0 %vm426_vm1, %v402_v6  ;;  %s1624_s9 = scalar_lea.vmem %s2038_s16, 128 }
  0x8d   : > { %1316 = vmatprep.mubr.msk.bf16.mxu1 %vm1710_vm0, %v1709_v0  ;;  %1310 = vmatprep.mubr.msk.bf16.mxu0 %vm1710_vm0, %v1709_v0  ;;  %p1625_p12 = scmp.ne.s32.totalorder %s2038_s16, %s1624_s9 }
  0x8f   : > { %p1626_p5 = pnand %p1625_p12, %p2115_p0 }
  0x91   : > { %p1627_p3 = pneg %p1626_p5 }
 0x14c   : > { %v531_v9 = vpop.f32.mrf.mxu1  ;;  %v464_v11 = vpop.f32.mrf.mxu0 }
 0x14d   : > { %v532_v10 = vadd.f32 %v1247_v7, %v531_v9  ;;  %v465_v12 = vadd.f32 %v1243_v8, %v464_v11 }
 0x14e   : > { %v1306_v13 = vpop.f32.mrf.mxu1  ;;  %v1298_v15 = vpop.f32.mrf.mxu0 }
 0x14f   : > { %v1970_v14 = vpack.c.bf16 %v532_v10, %v532_v10  ;;  %v537_v17 = vpack.c.bf16 %v465_v12, %v465_v12 }
 0x150   : > { %v534_v16 = vpop.f32.mrf.mxu1  ;;  %v467_v18 = vpop.f32.mrf.mxu0 }
 0x151   : > { %780 = vrot.lane.b32.xlu1 %v1970_v14, %s1711_s10  ;;  %658 = vrot.lane.b32.xlu0 %v1970_v14, %s1712_s21  ;;  %v544_v19 = vsel %vm539_vm2, %v1970_v14, 0 }
 0x152   : > { %v1307_v20 = vpop.f32.mrf.mxu1  ;;  %1309 = vmatpush3.bf16.xpose.msra.mxu0 %v544_v19  ;;  %v1299_v21 = vpop.f32.mrf.mxu0 }
 0x153   : > { %1320 = vmatprep.subr.bf16.mxu0 %v1709_v0 }
 0x155   : > { %778 = vrot.lane.b32.xlu1 %v537_v17, %s1711_s10  ;;  %656 = vrot.lane.b32.xlu0 %v537_v17, %s1712_s21  ;;  %s2036_s21 = scalar_lea.hbm %s2088_s8, %s1264_s11 }
 0x159   : > { %900 = vrot.lane.b32.xlu1 %v537_v17, %s1713_s4  ;;  %902 = vrot.lane.b32.xlu0 %v1970_v14, %s1713_s4  ;;  %s1092_s4 = scalar_lea.sflag [#allocation5], %s1927_s6 }
 0x15a   : > { %1311 = vmatmul.mubr.msk.bf16.vlgmr.msra.gmra.mxu0 %vm539_vm2, %v537_v17 }
 0x15b   : > { %1322 = vmatprep.mubr.msk.bf16.mxu0 %vm1710_vm0, %v1709_v0 }
 0x15d   : > { %602 = vrot.lane.b32.xlu1 %v1970_v14, %s1714_s20  ;;  %s1721_s20 = smov [#allocation12]  }
 0x1c3   : > { %v781_v22 = vpop.permute.xlu1 %780  ;;  %v659_v23 = vpop.permute.xlu0 %658 }
 0x1c4   : > { %v664_v24 = vsel %vm539_vm2, %v659_v23, 0  ;;  %v786_v28 = vsel %vm539_vm2, %v781_v22, 0 }
 0x1c5   : > { %1321 = vmatpush3.bf16.xpose.msra.mxu0 %v664_v24 }
 0x1c6   : > { %1332 = vmatprep.subr.bf16.mxu0 %v1709_v0 }
 0x1c7   : > { %v779_v25 = vpop.permute.xlu1 %778  ;;  %v657_v26 = vpop.permute.xlu0 %656 }
 0x1cb   : > { %v901_v27 = vpop.permute.xlu1 %900  ;;  %v903_v31 = vpop.permute.xlu0 %902 }
 0x1cc   : > { %1323 = vmatmul.mubr.msk.bf16.vlgmr.msra.gmra.mxu0 %vm539_vm2, %v657_v26  ;;  %v908_v32 = vsel %vm539_vm2, %v903_v31, 0 }
 0x1cd   : > { %1333 = vmatpush3.bf16.xpose.msra.mxu0 %v786_v28  ;;  %1334 = vmatprep.mubr.msk.bf16.mxu0 %vm1710_vm0, %v1709_v0 }
 0x1ce   : > { %1344 = vmatprep.subr.bf16.mxu0 %v1709_v0 }
 0x1cf   : > { %v603_v29 = vpop.permute.xlu1 %602 }
 0x1d0   : > { %v609_v30 = vsel %vm607_vm3, %v603_v29, 0 }
 0x1d1   : > { %1315 = vmatpush3.bf16.msra.mxu1 %v609_v30 }
 0x1d2   : > { %1326 = vmatprep.subr.bf16.mxu1 %v1709_v0 }
 0x1d4   : > { %1335 = vmatmul.mubr.msk.bf16.vlgmr.msra.gmra.mxu0 %vm539_vm2, %v779_v25 }
 0x1d5   : > { %1345 = vmatpush3.bf16.xpose.msra.mxu0 %v908_v32  ;;  %1346 = vmatprep.mubr.msk.bf16.mxu0 %vm1710_vm0, %v1709_v0 }
 0x1d6   : > { %1356 = vmatprep.subr.bf16.mxu0 %v1709_v0 }
 0x1dc   : > { %1347 = vmatmul.mubr.msk.bf16.vlgmr.msra.gmra.mxu0 %vm539_vm2, %v901_v27 }
 0x1dd   : > { %1360 = vmatprep.mubr.msk.bf16.mxu0 %vm1710_vm0, %v1709_v0 }
 0x21a   : > { %v580_v33 = vpop.f32.mrf.mxu0 }
 0x21b   : > { %v586_v34 = vsel %vm539_vm2, %v580_v33, -inf }
 0x21c   : > { %587 = vmax.xlane.f32.xlu0 %v586_v34  ;;  %v1312_v35 = vpop.f32.mrf.mxu0 }
 0x21e   : > { %v583_v36 = vpop.f32.mrf.mxu0 }
 0x220   : > { %v1313_v37 = vpop.f32.mrf.mxu0 }
 0x28c   : > { %v700_v38 = vpop.f32.mrf.mxu0 }
 0x28d   : > { %v706_v39 = vsel %vm539_vm2, %v700_v38, -inf }
 0x28e   : > { %707 = vmax.xlane.f32.xlu1 %v706_v39  ;;  %v1324_v40 = vpop.f32.mrf.mxu0 }
 0x290   : > { %v703_v41 = vpop.f32.mrf.mxu0 }
 0x292   : > { %v1325_v42 = vpop.f32.mrf.mxu0 }
 0x294   : > { %v822_v43 = vpop.f32.mrf.mxu0 }
 0x295   : > { %v828_v44 = vsel %vm539_vm2, %v822_v43, -inf }
 0x296   : > { %829 = vmax.xlane.f32.xlu0 %v828_v44  ;;  %v1336_v45 = vpop.f32.mrf.mxu0 }
 0x298   : > { %v825_v46 = vpop.f32.mrf.mxu0 }
 0x29a   : > { %v1337_v47 = vpop.f32.mrf.mxu0 }
 0x29c   : > { %v944_v48 = vpop.f32.mrf.mxu0 }
 0x29d   : > { %v950_v49 = vsel %vm539_vm2, %v944_v48, -inf }
 0x29e   : > { %951 = vmax.xlane.f32.xlu0 %v950_v49  ;;  %v1348_v50 = vpop.f32.mrf.mxu0 }
 0x29f   : > { %843 = vrot.lane.b32.xlu1 %v1970_v14, %s1715_s14  ;;  %s1628_s14 = sshll.u32 %s1721_s20, 4  ;;  %s1629_s14 = int_to_ptr.vmem [resolvable:$false] %s1628_s14 }
 0x2a0   : > { %v947_v51 = vpop.f32.mrf.mxu0  ;;  %p1631_p7 = scmp.lt.s32.totalorder %s2038_s16, %s1629_s14 }
 0x2a2   : > { %v1349_v52 = vpop.f32.mrf.mxu0 }
 0x2a3   : > { %965 = vrot.lane.b32.xlu1 %v1970_v14, %s1716_s17  ;;  %s1630_s17 = scalar_lea.vmem %s1629_s14, 256 }
 0x2a4   : > { %p1632_p9 = scmp.lt.s32.totalorder %s1630_s17, %s1624_s9 }
 0x2a5   : > { %v588_v53 = vpop.xlane.xlu0 %587 }
 0x2a6   : > { %v592_v54 = vsub.f32 %v580_v33, %v588_v53  ;;  %v589_v24 = vsub.f32 -inf, %v588_v53  ;;  %p1633_p13 = por %p1632_p9, %p1631_p7 }
 0x2a8   : > { %v593_v55 = vmul.f32 1.442695, %v592_v54  ;;  %v590_v25 = vmul.f32 1.442695, %v589_v24  ;;  %p1634_p8 = pnand %p1633_p13, %p1627_p3 }
 0x2aa   : > { %1466 = vpow2.f32 %v593_v55 }
 0x2b4   : > { %721 = vrot.lane.b32.xlu0 %v1970_v14, %s1717_s22 }
 0x2b7   : > { %v1467_v56 = vpop.eup %1466 }
 0x2b8   : > { %v600_v57 = vpack.c.bf16 %v1467_v56, %v1467_v56  ;;  %v596_v19 = vsel %vm539_vm2, %v1467_v56, 0.0 }
 0x2ba   : > { %1317 = vmatmul.mubr.msk.bf16.vlgmr.msra.gmra.mxu1 %vm539_vm2, %v600_v57 }
 0x2bb   : > { %1328 = vmatprep.mubr.msk.bf16.mxu1 %vm1710_vm0, %v1709_v0 }
 0x317   : > { %v708_v58 = vpop.xlane.xlu1 %707 }
 0x318   : > { %v712_v59 = vsub.f32 %v700_v38, %v708_v58  ;;  %v709_v29 = vsub.f32 -inf, %v708_v58 }
 0x31a   : > { %v713_v60 = vmul.f32 1.442695, %v712_v59  ;;  %v710_v33 = vmul.f32 1.442695, %v709_v29  ;;  %v1464_v59 = vld [vmem:[#allocation11 + $0x8] sm:$0xff]  }
 0x31b   : > { %v844_v8 = vpop.permute.xlu1 %843  ;;  %1357 = vmatpush3.bf16.msra.mxu0 %v1464_v59 }
 0x31c   : > { %1468 = vpow2.f32 %v713_v60  ;;  %v849_v10 = vsel %vm607_vm3, %v844_v8, 0  ;;  %1358 = vmatprep.subr.bf16.mxu0 %v1709_v0 }
 0x31f   : > { %v830_v61 = vpop.xlane.xlu0 %829  ;;  %v966_v13 = vpop.permute.xlu1 %965 }
 0x320   : > { %v834_v62 = vsub.f32 %v822_v43, %v830_v61  ;;  %v971_v15 = vsel %vm607_vm3, %v966_v13, 0  ;;  %v831_v34 = vsub.f32 -inf, %v830_v61 }
 0x322   : > { %v835_v63 = vmul.f32 1.442695, %v834_v62  ;;  %v832_v35 = vmul.f32 1.442695, %v831_v34 }
 0x324   : > { %1470 = vpow2.f32 %v835_v63  ;;  %v1465_v63 = vld [vmem:[#allocation11] sm:$0xff]  }
 0x325   : > { %1359 = vmatpush3.bf16.msra.mxu0 %v1465_v63 }
 0x327   : > { %v952_v1 = vpop.xlane.xlu0 %951 }
 0x328   : > { %v956_v2 = vsub.f32 %v944_v48, %v952_v1  ;;  %v953_v36 = vsub.f32 -inf, %v952_v1 }
 0x329   : > { %v1469_v3 = vpop.eup %1468 }
 0x32a   : > { %v957_v4 = vmul.f32 1.442695, %v956_v2  ;;  %v716_v5 = vsel %vm539_vm2, %v1469_v3, 0.0  ;;  %v720_v9 = vpack.c.bf16 %v1469_v3, %v1469_v3  ;;  %v954_v40 = vmul.f32 1.442695, %v953_v36 }
 0x32b   : > { %v722_v6 = vpop.permute.xlu0 %721  ;;  %717 = vadd.xlane.f32.xlu0 %v716_v5 }
 0x32c   : > { %v727_v7 = vsel %vm607_vm3, %v722_v6, 0  ;;  %1472 = vpow2.f32 %v957_v4 }
 0x32d   : > { %1327 = vmatpush3.bf16.msra.mxu1 %v727_v7  ;;  %1474 = vpow2.f32 %v590_v25 }
 0x32e   : > { %1338 = vmatprep.subr.bf16.mxu1 %v1709_v0 }
 0x330   : > { %1329 = vmatmul.mubr.msk.bf16.vlgmr.msra.gmra.mxu1 %vm539_vm2, %v720_v9 }
 0x331   : > { %1339 = vmatpush3.bf16.msra.mxu1 %v849_v10  ;;  %1340 = vmatprep.mubr.msk.bf16.mxu1 %vm1710_vm0, %v1709_v0  ;;  %v1471_v11 = vpop.eup %1470 }
 0x332   : > { %1350 = vmatprep.subr.bf16.mxu1 %v1709_v0  ;;  %v838_v12 = vsel %vm539_vm2, %v1471_v11, 0.0  ;;  %v842_v14 = vpack.c.bf16 %v1471_v11, %v1471_v11 }
 0x333   : > { %839 = vadd.xlane.f32.xlu1 %v838_v12 }
 0x338   : > { %1341 = vmatmul.mubr.msk.bf16.vlgmr.msra.gmra.mxu1 %vm539_vm2, %v842_v14 }
 0x339   : > { %1351 = vmatpush3.bf16.msra.mxu1 %v971_v15  ;;  %1352 = vmatprep.mubr.msk.bf16.mxu1 %vm1710_vm0, %v1709_v0  ;;  %v1473_v16 = vpop.eup %1472  ;;  %v1259_v15 = vld [vmem:[%s2087_s7] ss:$0 sm:$0xff] }
 0x33a   : > { %v960_v17 = vsel %vm539_vm2, %v1473_v16, 0.0  ;;  %v964_v18 = vpack.c.bf16 %v1473_v16, %v1473_v16  ;;  %v1475_v27 = vpop.eup %1474 }
 0x33b   : > { %961 = vadd.xlane.f32.xlu0 %v960_v17  ;;  %v595_v30 = vmul.f32 0.0, %v1475_v27 }
 0x33f   : > { %597 = vadd.xlane.f32.xlu0 %v596_v19 }
 0x340   : > { %1353 = vmatmul.mubr.msk.bf16.vlgmr.msra.gmra.mxu1 %vm539_vm2, %v964_v18 }
 0x37a   : > { %v645_v20 = vpop.f32.mrf.mxu1 }
 0x37b   : > { %v651_v37 = vadd.f32 %v645_v20, %v595_v30 }
 0x37c   : > { %v1318_v21 = vpop.f32.mrf.mxu1 }
 0x37e   : > { %v648_v22 = vpop.f32.mrf.mxu1 }
 0x380   : > { %v1319_v23 = vpop.f32.mrf.mxu1 }
 0x3b4   : > { %v718_v26 = vpop.xlane.xlu0 %717 }
 0x3bc   : > { %v840_v45 = vpop.xlane.xlu1 %839 }
 0x3c4   : > { %v962_v28 = vpop.xlane.xlu0 %961 }
 0x3c8   : > { %v598_v31 = vpop.xlane.xlu0 %597 }
 0x3c9   : > { %v599_v32 = vadd.f32 %v598_v31, %v595_v30 }
 0x3cb   : > { %1476 = vrcp.f32 %v599_v32 }
 0x3cc   : > { %1478 = vpow2.f32 %v710_v33 }
 0x3cd   : > { %1480 = vpow2.f32 %v832_v35 }
 0x3ce   : > { %1482 = vpow2.f32 %v954_v40 }
 0x3d8   : > { %v1477_v38 = vpop.eup %1476 }
 0x3d9   : > { %v653_v39 = vmul.f32 %v1477_v38, %v651_v37  ;;  %v1479_v41 = vpop.eup %1478 }
 0x3da   : > { %v715_v42 = vmul.f32 0.0, %v1479_v41  ;;  %v1481_v44 = vpop.eup %1480 }
 0x3db   : > { %654 = vst.msk [vmem:[#allocation2] sm:$0xff] %vm539_vm2, %v653_v39  ;;  %v837_v46 = vmul.f32 0.0, %v1481_v44  ;;  %v1483_v48 = vpop.eup %1482 }
 0x3dc   : > { %v719_v43 = vadd.f32 %v718_v26, %v715_v42  ;;  %v959_v49 = vmul.f32 0.0, %v1483_v48 }
 0x3dd   : > { %v841_v47 = vadd.f32 %v840_v45, %v837_v46 }
 0x3de   : > { %1484 = vrcp.f32 %v719_v43  ;;  %v963_v51 = vadd.f32 %v962_v28, %v959_v49 }
 0x3df   : > { %1486 = vrcp.f32 %v841_v47 }
 0x3e0   : > { %1488 = vrcp.f32 %v963_v51 }
 0x3eb   : > { %v1485_v53 = vpop.eup %1484 }
 0x3ec   : > { %v1487_v61 = vpop.eup %1486 }
 0x3ed   : > { %v1489_v6 = vpop.eup %1488 }
 0x3f0   : > { %v763_v50 = vpop.f32.mrf.mxu1 }
 0x3f1   : > { %v769_v52 = vadd.f32 %v763_v50, %v715_v42 }
 0x3f2   : > { %v1330_v54 = vpop.f32.mrf.mxu1 }
 0x3f3   : > { %v771_v55 = vmul.f32 %v1485_v53, %v769_v52 }
 0x3f4   : > { %v766_v56 = vpop.f32.mrf.mxu1 }
 0x3f5   : > { %773 = vrot.lane.b32.xlu1 %v771_v55, %s1718_s29 }
 0x3f6   : > { %v1331_v57 = vpop.f32.mrf.mxu1 }
 0x3f8   : > { %v885_v58 = vpop.f32.mrf.mxu1 }
 0x3f9   : > { %v891_v60 = vadd.f32 %v885_v58, %v837_v46 }
 0x3fa   : > { %v1342_v62 = vpop.f32.mrf.mxu1 }
 0x3fb   : > { %v893_v1 = vmul.f32 %v1487_v61, %v891_v60 }
 0x3fc   : > { %v888_v2 = vpop.f32.mrf.mxu1 }
 0x3fd   : > { %895 = vrot.lane.b32.xlu0 %v893_v1, %s1719_s23 }
 0x3fe   : > { %v1343_v3 = vpop.f32.mrf.mxu1 }
 0x400   : > { %v1007_v4 = vpop.f32.mrf.mxu1 }
 0x401   : > { %v1013_v5 = vadd.f32 %v1007_v4, %v959_v49 }
 0x402   : > { %v1354_v7 = vpop.f32.mrf.mxu1 }
 0x403   : > { %v1015_v8 = vmul.f32 %v1489_v6, %v1013_v5 }
 0x404   : > { %v1010_v9 = vpop.f32.mrf.mxu1 }
 0x405   : > { %1017 = vrot.lane.b32.xlu1 %v1015_v8, %s1720_s15 }
 0x406   : > { %v1355_v10 = vpop.f32.mrf.mxu1 }
 0x467   : > { %v774_v11 = vpop.permute.xlu1 %773 }
 0x468   : > { %777 = vst.msk [vmem:[#allocation2] sm:$0xff] %vm776_vm4, %v774_v11 }
 0x46f   : > { %v896_v0 = vpop.permute.xlu0 %895 }
 0x470   : > { %899 = vst.msk [vmem:[#allocation2] sm:$0xff] %vm898_vm5, %v896_v0 }
 0x477   : > { %v1018_v12 = vpop.permute.xlu1 %1017 }
 0x478   : > { %1021 = vst.msk [vmem:[#allocation2] sm:$0xff] %vm1020_vm6, %v1018_v12 }
 0x47f   : > { %v1022_v13 = vld [vmem:[#allocation2] sm:$0xff] }
 0x480   : > { %v1023_v14 = vpack.c.bf16 %v1022_v13, %v1022_v13 }
 0x482   : > { %1361 = vmatmul.mubr.msk.bf16.vlgmr.msra.gmra.mxu0 %vm426_vm1, %v1023_v14 }
 0x542   : > { %v1084_v16 = vpop.f32.mrf.mxu0 }
 0x543   : > { %v1085_v17 = vadd.f32 %v1259_v15, %v1084_v16 }
 0x544   : > { %v1362_v18 = vpop.f32.mrf.mxu0 }
 0x545   : > { %1090 = vst.msk [vmem:[%s400_s24] sm:$0xff] %vm426_vm1, %v1085_v17 }
 0x546   : > { %v1087_v19 = vpop.f32.mrf.mxu0 }
 0x547   : > { %1637 = shalt.err (!%p1634_p8)
}
 0x548   : > { %s1638_s22 = scalar_lea.hbm %s2036_s21, 128  ;;  %s1642_s23 = scalar_lea.hbm %s2088_s8, 256 }
 0x549   : > { %p1639_p10 = scmp.ne.s32.totalorder %s2036_s21, %s1638_s22  ;;  %p1643_p2 = scmp.lt.s32.totalorder %s2036_s21, %s2088_s8 }
 0x54a   : > { %p1644_p4 = scmp.lt.s32.totalorder %s1642_s23, %s1638_s22 }
 0x54b   : > { %p1640_p1 = pnand %p1639_p10, %p2115_p0 }
 0x54c   : > { %p1645_p6 = por %p1644_p4, %p1643_p2 }
 0x54d   : > { %p1641_p11 = pneg %p1640_p1 }
 0x54f   : > { %p1646_p12 = pnand %p1645_p6, %p1641_p11 }
 0x551   : > { %1649 = shalt.err (!%p1646_p12)
}
 0x552   : > { %1380 = dma.vmem_to_hbm [thread:$0]  (%p2115_p0), %s2038_s16, 128, %s2036_s21, %s1092_s4   ;;  %v1363_v20 = vpop.f32.mrf.mxu0 }
 0x553 PF: > { %s1117_s19 = sand.u32 1, %s1688_s27   ;;  %p2116_p5 = scmp.ne.s32.totalorder %s2099_s12, 0 }
 0x554   : > { %p2117_p3 = scmp.ge.s32.totalorder %s1700_s30, 2  ;;  %s1118_s13 = scalar_lea.sflag [#allocation5], %s1117_s19 }
 0x556   : > { %p1400_p7 = pnand %p2117_p3, %p2116_p5 }
 0x558   : > { %p1401_p9 = pneg %p1400_p7 }
 0x55a   : > { %1683 = dma.done.wait (%p1401_p9), %s1118_s13, 128  }
 0x55b   : > { %1685 = vsyncadd (%p1401_p9), %s1118_s13, 4294967168  ;;  %s2118_s11 = sld [smem:[#allocation18_spill]]  ;;  %p25_p13 = scmp.ge.s32.totalorder %s1847_s18, 4  }
 0x55c   : > { %s2119_s29 = sld [smem:[#allocation19_spill]]  ;;  %s2120_s27 = smov %s1692_s28 }
 0x55d   : > { %s2122_s30 = smov %s1847_s18  ;;  %27 = sbr.rel (!%p25_p13) target bundleno = 12 (0xc), region = 122 }
 0x561   : > { %s2121_s28 = smov %s2118_s11 }
 0x562   :  { %1123 = vsyncpa [#allocation4], 1 }
 0x563   :  { %1125 = vsyncpa [#allocation4 + $0x1], 1 }
 0x564   :  { %1126 = vsyncpa [#allocation7], 1 }
 0x565   :  { %1128 = vsyncpa [#allocation7 + $0x1], 1 }
 0x566   :  { %1129 = vsyncpa [#allocation10], 1 }
 0x567   :  { %1130 = vsyncpa [#allocation5], 1 }
 0x568   :  { %1132 = vsyncpa [#allocation5 + $0x1], 1 }

</bundles_post_ra>
